<compile_context>
chip_gen: v6e
topology: v6e:2x2x1
jax: 0.10.0
libtpu: 0.0.40
codegen_flags: <defaults>
</compile_context>

<pallas_src>
import functools

import numpy as np

import jax
import jax.numpy as jnp
from jax import lax
from jax.experimental import pallas as pl
from jax.experimental.pallas import tpu as pltpu

EPS = 1e-6  # LayerNorm epsilon (added to biased variance, inside rsqrt)

_ROW_TILE_CANDIDATES = (512, 256, 128, 64, 32, 16, 8)


def _row_tile(n, max_tile=512):
    """Largest row tile <= max_tile that divides n, else the full extent."""
    if n <= max_tile:
        return n
    for t in _ROW_TILE_CANDIDATES:
        if t <= max_tile and n % t == 0:
            return t
    # TODO(synk): pad ragged row counts to a multiple of 8 instead of falling
    # back to a single full-array block.
    return n


def _compiler_params():
    return pltpu.CompilerParams(
        dimension_semantics=("parallel",),        # rows are independent
        vmem_limit_bytes=32 * 1024 * 1024,        # safe on v5e/v6e/v7x
    )


def _ln(x_f32, gamma_f32, beta_f32):
    mean = jnp.mean(x_f32, axis=-1, keepdims=True)
    xc = x_f32 - mean
    var = jnp.mean(xc * xc, axis=-1, keepdims=True)
    return xc * lax.rsqrt(var + EPS) * gamma_f32 + beta_f32


# ------------------- fused LN -> dot -> bias -> dropout -> +x -----------------
def _fused_kernel(*refs, keep_thr, inv_keep, apply_dropout):
    if apply_dropout:
        x_ref, g_ref, b_ref, w_ref, bias_ref, bits_ref, o_ref = refs
    else:
        x_ref, g_ref, b_ref, w_ref, bias_ref, o_ref = refs
        bits_ref = None

    x = x_ref[...].astype(jnp.float32)
    normed = _ln(x, g_ref[...].astype(jnp.float32), b_ref[...].astype(jnp.float32))
    # bf16 MXU operands, f32 accumulation.
    y = jnp.dot(normed.astype(w_ref.dtype), w_ref[...],
                preferred_element_type=jnp.float32)
    y = y + bias_ref[...].astype(jnp.float32)
    if apply_dropout:
        keep = bits_ref[...] >= np.uint32(keep_thr)   # integer threshold compare
        y = jnp.where(keep, y * inv_keep, 0.0)
    o_ref[...] = (x + y).astype(o_ref.dtype)


def fused_prenorm_linear_residual(x2, gamma, beta, w_lo, bias, *,
                                  p, apply_dropout, bits=None):
    n, h = x2.shape
    h2 = w_lo.shape[1]
    assert h2 == h, "residual connection requires sublayer output size == input size"
    tile_n = _row_tile(n)
    grid = (n // tile_n,)

    keep_thr = min(int(round(p * 2.0 ** 32)), 2 ** 32 - 1) if apply_dropout else 0
    inv_keep = 1.0 / (1.0 - p) if apply_dropout else 1.0
    kernel = functools.partial(_fused_kernel, keep_thr=keep_thr,
                               inv_keep=inv_keep, apply_dropout=apply_dropout)

    in_specs = [
        pl.BlockSpec((tile_n, h), lambda i: (i, 0)),    # x
        pl.BlockSpec((1, h), lambda i: (0, 0)),          # gamma
        pl.BlockSpec((1, h), lambda i: (0, 0)),          # beta
        pl.BlockSpec((h, h2), lambda i: (0, 0)),         # W (bf16)
        pl.BlockSpec((1, h2), lambda i: (0, 0)),         # bias
    ]
    args = [x2, gamma, beta, w_lo, bias]
    if apply_dropout:
        in_specs.append(pl.BlockSpec((tile_n, h2), lambda i: (i, 0)))  # rand bits
        args.append(bits)

    return pl.pallas_call(
        kernel,
        out_shape=jax.ShapeDtypeStruct((n, h2), x2.dtype),
        grid=grid,
        in_specs=in_specs,
        out_specs=pl.BlockSpec((tile_n, h2), lambda i: (i, 0)),
        compiler_params=_compiler_params(),
    )(*args)


# ----------------------- fallback kernels (arbitrary sublayer) ----------------
def _layernorm_kernel(x_ref, g_ref, b_ref, o_ref):
    x = x_ref[...].astype(jnp.float32)
    o_ref[...] = _ln(x, g_ref[...].astype(jnp.float32),
                     b_ref[...].astype(jnp.float32)).astype(o_ref.dtype)


def layernorm(x2, gamma, beta):
    n, h = x2.shape
    tile_n = _row_tile(n)
    return pl.pallas_call(
        _layernorm_kernel,
        out_shape=jax.ShapeDtypeStruct((n, h), x2.dtype),
        grid=(n // tile_n,),
        in_specs=[
            pl.BlockSpec((tile_n, h), lambda i: (i, 0)),
            pl.BlockSpec((1, h), lambda i: (0, 0)),
            pl.BlockSpec((1, h), lambda i: (0, 0)),
        ],
        out_specs=pl.BlockSpec((tile_n, h), lambda i: (i, 0)),
        compiler_params=_compiler_params(),
    )(x2, gamma, beta)


def _residual_dropout_kernel(*refs, keep_thr, inv_keep, apply_dropout):
    if apply_dropout:
        x_ref, y_ref, bits_ref, o_ref = refs
    else:
        x_ref, y_ref, o_ref = refs
        bits_ref = None
    x = x_ref[...].astype(jnp.float32)
    y = y_ref[...].astype(jnp.float32)
    if apply_dropout:
        keep = bits_ref[...] >= np.uint32(keep_thr)
        y = jnp.where(keep, y * inv_keep, 0.0)
    o_ref[...] = (x + y).astype(o_ref.dtype)


def residual_dropout(x2, y2, *, p, apply_dropout, bits=None):
    n, h = x2.shape
    tile_n = _row_tile(n)
    keep_thr = min(int(round(p * 2.0 ** 32)), 2 ** 32 - 1) if apply_dropout else 0
    inv_keep = 1.0 / (1.0 - p) if apply_dropout else 1.0
    kernel = functools.partial(_residual_dropout_kernel, keep_thr=keep_thr,
                               inv_keep=inv_keep, apply_dropout=apply_dropout)
    in_specs = [
        pl.BlockSpec((tile_n, h), lambda i: (i, 0)),
        pl.BlockSpec((tile_n, h), lambda i: (i, 0)),
    ]
    args = [x2, y2]
    if apply_dropout:
        in_specs.append(pl.BlockSpec((tile_n, h), lambda i: (i, 0)))
        args.append(bits)
    return pl.pallas_call(
        kernel,
        out_shape=jax.ShapeDtypeStruct((n, h), x2.dtype),
        grid=(n // tile_n,),
        in_specs=in_specs,
        out_specs=pl.BlockSpec((tile_n, h), lambda i: (i, 0)),
        compiler_params=_compiler_params(),
    )(*args)


# ------------------------------- module wrappers ------------------------------
class PallasLinear:
    """Linear sublayer (returns a tuple so that `sublayer(...)[0]` applies).

    When passed to SublayerConnection it is fused into the single Pallas
    kernel; standalone calls run as plain JAX (bf16 MXU, f32 accumulate).
    """

    def __init__(self, w, b):
        self.w = jnp.asarray(w, jnp.float32)
        self.w_lo = self.w.astype(jnp.bfloat16)   # cast once, reused every call
        self.b = jnp.asarray(b, jnp.float32).reshape(1, -1)

    def __call__(self, z):
        y = jnp.dot(z.astype(jnp.bfloat16), self.w_lo,
                    preferred_element_type=jnp.float32) + self.b
        return (y.astype(z.dtype), None)


class SublayerConnection:
    """x + dropout(sublayer(LayerNorm(x))[0]) -- pre-norm residual."""

    def __init__(self, size, dropout):
        # PyTorch LayerNorm default init: gamma = 1, beta = 0.
        self.gamma = jnp.ones((1, size), jnp.float32)
        self.beta = jnp.zeros((1, size), jnp.float32)
        self.p = float(dropout)

    def __call__(self, x, sublayer, *, training=True, rng=None):
        b, s, h = x.shape
        n = b * s
        x2 = x.reshape(n, h)
        apply_dropout = bool(training) and self.p > 0.0
        bits = None
        if apply_dropout:
            if rng is None:
                rng = jax.random.PRNGKey(0)
            bits = jax.random.bits(rng, shape=(n, h), dtype=jnp.uint32)

        if isinstance(sublayer, PallasLinear):
            # Fully fused fast path: one HBM round trip over the activations.
            out2 = fused_prenorm_linear_residual(
                x2, self.gamma, self.beta, sublayer.w_lo, sublayer.b,
                p=self.p, apply_dropout=apply_dropout, bits=bits)
        else:
            # TODO(synk): arbitrary user sublayers cannot be fused into the
            # kernel; they run as plain JAX between two tiled Pallas kernels.
            normed = layernorm(x2, self.gamma, self.beta).reshape(b, s, h)
            y2 = sublayer(normed)[0].reshape(n, h)
            out2 = residual_dropout(x2, y2, p=self.p,
                                    apply_dropout=apply_dropout, bits=bits)
        return out2.reshape(b, s, h)


# ------------------------------------ main ------------------------------------
if __name__ == "__main__":
    B, S, H = 4, 256, 128           # n = 1024 rows -> two 512-row tiles
    P_DROP = 0.1

    key = jax.random.PRNGKey(0)
    kx, kw, kb = jax.random.split(key, 3)
    x = jax.random.normal(kx, (B, S, H), dtype=jnp.float32)
    w = jax.random.normal(kw, (H, H), dtype=jnp.float32) * 0.02
    bias = jax.random.normal(kb, (1, H), dtype=jnp.float32) * 0.02

    sub = PallasLinear(w, bias)
    module = SublayerConnection(size=H, dropout=P_DROP)

    # Pure-JAX reference pieces (same bf16 matmul operands as the kernel).
    x2 = x.reshape(B * S, H)
    mean = x2.mean(-1, keepdims=True)
    var = ((x2 - mean) ** 2).mean(-1, keepdims=True)
    normed_ref = (x2 - mean) * lax.rsqrt(var + EPS)
    y_ref = jnp.dot(normed_ref.astype(jnp.bfloat16), w.astype(jnp.bfloat16),
                    preferred_element_type=jnp.float32) + bias

    # --- eval mode (dropout identity), fused path ---
    out_eval = jax.block_until_ready(module(x, sub, training=False))
    ref_eval = (x2 + y_ref).reshape(B, S, H)
    assert jnp.allclose(out_eval, ref_eval, rtol=1e-2, atol=1e-2), "eval mismatch"

    # --- training mode (dropout via uint32 threshold compare), fused path ---
    rng = jax.random.PRNGKey(1234)
    out_train = jax.block_until_ready(module(x, sub, training=True, rng=rng))
    bits = jax.random.bits(rng, shape=(B * S, H), dtype=jnp.uint32)
    thr = np.uint32(min(int(round(P_DROP * 2.0 ** 32)), 2 ** 32 - 1))
    keep = bits >= thr
    ref_train = (x2 + jnp.where(keep, y_ref / (1.0 - P_DROP), 0.0)).reshape(B, S, H)
    assert jnp.allclose(out_train, ref_train, rtol=1e-2, atol=1e-2), "train mismatch"

    # --- arbitrary (non-linear) sublayer exercises the unfused fallback ---
    out_fb = jax.block_until_ready(
        module(x, lambda z: (jnp.tanh(z), None), training=False))
    ref_fb = (x2 + jnp.tanh(normed_ref)).reshape(B, S, H)
    assert jnp.allclose(out_fb, ref_fb, rtol=1e-3, atol=1e-3), "fallback mismatch"

    print("KERNEL_OK")
</pallas_src>

<mosaic_0001>
module attributes {stable_mosaic.version = 11 : i64} {
  func.func @_fused_kernel(%arg0: i32, %arg1: memref<512x128xf32, #tpu.memory_space<vmem>>, %arg2: memref<1x128xf32, #tpu.memory_space<vmem>>, %arg3: memref<1x128xf32, #tpu.memory_space<vmem>>, %arg4: memref<128x128xbf16, #tpu.memory_space<vmem>>, %arg5: memref<1x128xf32, #tpu.memory_space<vmem>>, %arg6: memref<512x128xf32, #tpu.memory_space<vmem>>) attributes {dimension_semantics = [#tpu.dimension_semantics<parallel>], iteration_bounds = array<i64: 2>, scalar_prefetch = 0 : i64, scratch_operands = 0 : i64, tpu.core_type = #tpu.core_type<tc>, window_params = [{transform_indices = @transform_0, window_bounds = array<i64: 512, 128>}, {pipeline_mode = #tpu.pipeline_mode<synchronous>, transform_indices = @transform_1, window_bounds = array<i64: 1, 128>}, {pipeline_mode = #tpu.pipeline_mode<synchronous>, transform_indices = @transform_2, window_bounds = array<i64: 1, 128>}, {pipeline_mode = #tpu.pipeline_mode<synchronous>, transform_indices = @transform_3, window_bounds = array<i64: 128, 128>}, {pipeline_mode = #tpu.pipeline_mode<synchronous>, transform_indices = @transform_4, window_bounds = array<i64: 1, 128>}, {transform_indices = @transform_5, window_bounds = array<i64: 512, 128>}]} {
    %c0 = arith.constant 0 : index
    %c0_0 = arith.constant 0 : index
    %0 = vector.load %arg1[%c0, %c0_0] : memref<512x128xf32, #tpu.memory_space<vmem>>, vector<512x128xf32>
    %c0_1 = arith.constant 0 : index
    %c0_2 = arith.constant 0 : index
    %1 = vector.load %arg2[%c0_1, %c0_2] : memref<1x128xf32, #tpu.memory_space<vmem>>, vector<1x128xf32>
    %c0_3 = arith.constant 0 : index
    %c0_4 = arith.constant 0 : index
    %2 = vector.load %arg3[%c0_3, %c0_4] : memref<1x128xf32, #tpu.memory_space<vmem>>, vector<1x128xf32>
    %cst = arith.constant dense<0.000000e+00> : vector<512xf32>
    %3 = vector.multi_reduction <add>, %0, %cst [1] : vector<512x128xf32> to vector<512xf32>
    %4 = vector.shape_cast %3 : vector<512xf32> to vector<512x1xf32>
    %cst_5 = arith.constant 1.280000e+02 : f32
    %5 = vector.broadcast %cst_5 : f32 to vector<512x1xf32>
    %6 = arith.divf %4, %5 : vector<512x1xf32>
    %7 = vector.broadcast %6 : vector<512x1xf32> to vector<512x128xf32>
    %8 = arith.subf %0, %7 : vector<512x128xf32>
    %9 = arith.mulf %8, %8 : vector<512x128xf32>
    %cst_6 = arith.constant dense<0.000000e+00> : vector<512xf32>
    %10 = vector.multi_reduction <add>, %9, %cst_6 [1] : vector<512x128xf32> to vector<512xf32>
    %11 = vector.shape_cast %10 : vector<512xf32> to vector<512x1xf32>
    %cst_7 = arith.constant 1.280000e+02 : f32
    %12 = vector.broadcast %cst_7 : f32 to vector<512x1xf32>
    %13 = arith.divf %11, %12 : vector<512x1xf32>
    %cst_8 = arith.constant 9.99999997E-7 : f32
    %14 = vector.broadcast %cst_8 : f32 to vector<512x1xf32>
    %15 = arith.addf %13, %14 : vector<512x1xf32>
    %16 = math.rsqrt %15 : vector<512x1xf32>
    %17 = vector.broadcast %16 : vector<512x1xf32> to vector<512x128xf32>
    %18 = arith.mulf %8, %17 : vector<512x128xf32>
    %19 = vector.broadcast %1 : vector<1x128xf32> to vector<512x128xf32>
    %20 = arith.mulf %18, %19 : vector<512x128xf32>
    %21 = vector.broadcast %2 : vector<1x128xf32> to vector<512x128xf32>
    %22 = arith.addf %20, %21 : vector<512x128xf32>
    %23 = arith.truncf %22 : vector<512x128xf32> to vector<512x128xbf16>
    %c0_9 = arith.constant 0 : index
    %c0_10 = arith.constant 0 : index
    %24 = vector.load %arg4[%c0_9, %c0_10] : memref<128x128xbf16, #tpu.memory_space<vmem>>, vector<128x128xbf16>
    %cst_11 = arith.constant dense<0.000000e+00> : vector<512x128xf32>
    %25 = tpu.matmul %23, %24, %cst_11 {dimension_numbers = #tpu.dot_dimension_numbers<[1], [0], [0], [1], [0, 0, 1, 1], [], []>} : vector<512x128xbf16>, vector<128x128xbf16>, vector<512x128xf32> -> vector<512x128xf32>
    %c0_12 = arith.constant 0 : index
    %c0_13 = arith.constant 0 : index
    %26 = vector.load %arg5[%c0_12, %c0_13] : memref<1x128xf32, #tpu.memory_space<vmem>>, vector<1x128xf32>
    %27 = vector.broadcast %26 : vector<1x128xf32> to vector<512x128xf32>
    %28 = arith.addf %25, %27 : vector<512x128xf32>
    %29 = arith.addf %0, %28 : vector<512x128xf32>
    %c0_14 = arith.constant 0 : index
    %c0_15 = arith.constant 0 : index
    %30 = vector.load %arg6[%c0_14, %c0_15] : memref<512x128xf32, #tpu.memory_space<vmem>>, vector<512x128xf32>
    tpu.vector_store %arg6[%c0_14, %c0_15], %29 {strides = array<i32>} : memref<512x128xf32, #tpu.memory_space<vmem>>, vector<512x128xf32>,
    return
  }
  func.func @transform_0(%arg0: i32) -> (i32, i32) {
    %c0_i32 = arith.constant 0 : i32
    %c0_i32_0 = arith.constant 0 : i32
    return %arg0, %c0_i32 : i32, i32
  }
  func.func @transform_1(%arg0: i32) -> (i32, i32) {
    %c0_i32 = arith.constant 0 : i32
    %c0_i32_0 = arith.constant 0 : i32
    %c0_i32_1 = arith.constant 0 : i32
    return %c0_i32, %c0_i32_0 : i32, i32
  }
  func.func @transform_2(%arg0: i32) -> (i32, i32) {
    %c0_i32 = arith.constant 0 : i32
    %c0_i32_0 = arith.constant 0 : i32
    %c0_i32_1 = arith.constant 0 : i32
    return %c0_i32, %c0_i32_0 : i32, i32
  }
  func.func @transform_3(%arg0: i32) -> (i32, i32) {
    %c0_i32 = arith.constant 0 : i32
    %c0_i32_0 = arith.constant 0 : i32
    %c0_i32_1 = arith.constant 0 : i32
    return %c0_i32, %c0_i32_0 : i32, i32
  }
  func.func @transform_4(%arg0: i32) -> (i32, i32) {
    %c0_i32 = arith.constant 0 : i32
    %c0_i32_0 = arith.constant 0 : i32
    %c0_i32_1 = arith.constant 0 : i32
    return %c0_i32, %c0_i32_0 : i32, i32
  }
  func.func @transform_5(%arg0: i32) -> (i32, i32) {
    %c0_i32 = arith.constant 0 : i32
    %c0_i32_0 = arith.constant 0 : i32
    return %arg0, %c0_i32 : i32, i32
  }
}

</mosaic_0001>

<bundles_post_ra>
// kernel: tpu_custom_call.1
= control target key start
LH: loop header
LB: loop body
LE: loop exit
PB: predicated region body
PF: predicated region fallthrough
CT: control target
= control target key end

     0   :  { %10 = vsyncpa [#allocation3], 0  ;;  %s3539_s0 = inlined_call_operand.hbm [shape: f32[1024,128], index: 0, kind: input, shape index: {}]   ;;  %s3540_s1 = inlined_call_operand.vmem [shape: f32[1,128], index: 1, kind: input, shape index: {}]   ;;  %s3541_s2 = inlined_call_operand.vmem [shape: f32[1,128], index: 2, kind: input, shape index: {}]   ;;  %s3542_s3 = inlined_call_operand.hbm [shape: bf16[128,128], index: 3, kind: input, shape index: {}]   ;;  %s3543_s4 = inlined_call_operand.vmem [shape: f32[1,128], index: 4, kind: input, shape index: {}]   ;;  %s3544_s5 = inlined_call_operand.hbm [shape: f32[1024,128], index: 5, kind: output, shape index: {}]  }
   0x1   :  { %12 = vsyncpa [#allocation3 + $0x1], 0 }
   0x2   :  { %13 = vsyncpa [#allocation6], 0 }
   0x3   :  { %14 = vsyncpa [#allocation4], 0 }
   0x4   :  { %16 = vsyncpa [#allocation4 + $0x1], 0  ;;  %s2382_s18 = smov 0   ;;  %s2384_s19 = smov 0  }
   0x5   :  { %s2386_s20 = smov 0   ;;  %s2388_s21 = smov 0  }
   0x6 LB: > { %s2403_s22 = sadd.s32 4294967295, %s2341_s21   ;;  %s1789_s23 = sadd.s32 4294967294, %s2341_s21   ;;  %s2341_s21 = sphi %s2388_s21, %s3665_s21   ;;  %s2337_s20 = sphi %s2386_s20, %s3664_s20   ;;  %s2333_s19 = sphi %s2384_s19, %s3663_s19   ;;  %s2329_s18 = sphi %s2382_s18, %s3662_s18  }
   0x7   : > { %p42_p0 = scmp.ne.s32.totalorder %s2333_s19, %s2329_s18  ;;  %p3545_p1 = scmp.eq.s32.totalorder %s2403_s22, 0 }
   0x8   : > { %p156_p3 = scmp.eq.s32.totalorder %s1789_s23, 1  ;;  %p1790_p5 = scmp.ge.s32.totalorder %s2341_s21, 1 }
   0x9   : > { %p2412_p4 = por %p3545_p1, %p42_p0  ;;  %p163_p7 = scmp.lt.s32.totalorder %s2341_s21, 3 }
   0xa   : > { %p2417_p6 = por %p156_p3, %p42_p0  ;;  %s2343_s27 = smov [#allocation5]  }
   0xb   : > { %s3582_s24 = scalar_select %p2412_p4, 1, 0 }
   0xc   : > { %s3583_s25 = scalar_select %p2417_p6, 1, 0 }
   0xd   : > { %p2422_p8 = pnand %p1790_p5, %p163_p7  ;;  %s181_s28 = sshll.u32 %s2343_s27, 4  ;;  %s182_s28 = int_to_ptr.vmem [resolvable:$true] %s181_s28 }
   0xe   : > { %s2436_s30 = sadd.s32 1, %s2341_s21   ;;  %s29_s6 = sadd.s32 1, %s2337_s20 }
   0xf   : > { %s3584_s26 = scalar_select %p2422_p8, 1, 0 }
  0x10   : > { %p1962_p9 = pneg %p2422_p8  ;;  %s26_s7 = ssub.s32 %s2341_s21, %s2436_s30 }
  0x11   : > { %s2230_s8 = scalar_lea.vmem %s182_s28, 1024  ;;  %p2238_p5 = scmp.lt.s32.totalorder %s182_s28, %s182_s28 }
  0x12   : > { %p2431_p11 = pnand %p1962_p9, %p3545_p1  ;;  %p2231_p13 = scmp.ne.s32.totalorder %s182_s28, %s2230_s8 }
  0x13   : > { %p2239_p7 = scmp.lt.s32.totalorder %s2230_s8, %s2230_s8 }
  0x14   : > { %p2221_p12 = pneg %p2431_p11 }
  0x15   : > { %p2240_p10 = por %p2239_p7, %p2238_p5 }
  0x16   : > { %p2233_p0 = pnand %p2231_p13, %p2221_p12 }
  0x18   : > { %p2234_p3 = pneg %p2233_p0 }
  0x1a   : > { %p2241_p2 = pnand %p2240_p10, %p2234_p3 }
  0x1c   : > { %2244 = shalt.err (!%p2241_p2)
}
  0x1d   : > { %s2344_s9 = smov 64   ;;  %s2345_s10 = smov 4  }
  0x1e   : > { %1965 = dma.hbm_to_vmem [thread:$0]  (!%p2431_p11), %s3542_s3, 1024, %s182_s28, [#allocation6], %s2344_s9, %s2344_s9, %s2345_s10  }
  0x1f   : > { %p27_p9 = scmp.eq.s32.totalorder %s26_s7, 0  ;;  %p36_p12 = scmp.ne.s32.totalorder %s2337_s20, %s2333_s19 }
  0x20   : > { %p37_p10 = scmp.eq.s32.totalorder %s2341_s21, 0  ;;  %p1975_p2 = scmp.lt.s32.totalorder %s2341_s21, 2 }
  0x21   : > { %s2453_s13 = scalar_select %p27_p9, %s2337_s20, %s29_s6  }
  0x22   : > { %p38_p13 = por %p37_p10, %p36_p12  ;;  %p3586_p0 = scmp.eq.s32.totalorder %s2403_s22, 1 }
  0x23   : > { %s198_s15 = sand.u32 1, %s2337_s20   ;;  %s1816_s16 = sshll.u32 %s2341_s21, 13 }
  0x24   : > { %p2457_p3 = por %p3586_p0, %p36_p12  ;;  %s1793_s17 = sshll.u32 %s198_s15, 9 }
  0x25   : > { %s2466_s29 = scalar_lea.hbm %s3539_s0, %s1816_s16  ;;  %s202_s28 = scalar_lea.vmem [#allocation2], %s1793_s17 }
  0x26   : > { %s3587_s14 = scalar_select %p2457_p3, 1, 0 }
  0x27   : > { %s209_s6 = sshll.u32 %s202_s28, 4  ;;  %p2468_p11 = pnand %p1975_p2, %p38_p13  ;;  %s2472_s6 = int_to_ptr.vmem [resolvable:$true] %s209_s6 }
  0x28   : > { %s2474_s8 = scalar_lea.sflag [#allocation3], %s198_s15  ;;  %s2245_s9 = scalar_lea.hbm %s2466_s29, 8192 }
  0x29   : > { %p2246_p5 = scmp.ne.s32.totalorder %s2466_s29, %s2245_s9  ;;  %p2247_p7 = pneg %p2468_p11 }
  0x2a   : > { %s2250_s12 = scalar_lea.hbm %s3539_s0, 16384  ;;  %p2251_p10 = scmp.lt.s32.totalorder %s2466_s29, %s3539_s0 }
  0x2b   : > { %p2248_p9 = pnand %p2247_p7, %p2246_p5  ;;  %p2252_p2 = scmp.lt.s32.totalorder %s2250_s12, %s2245_s9 }
  0x2d   : > { %p2249_p12 = pneg %p2248_p9  ;;  %p2253_p13 = por %p2252_p2, %p2251_p10 }
  0x2f   : > { %p2254_p0 = pnand %p2253_p13, %p2249_p12 }
  0x31   : > { %2257 = shalt.err (!%p2254_p0)
}
  0x32   : > { %s2258_s15 = scalar_lea.vmem %s2472_s6, 8192  ;;  %s2346_s23 = smov [#allocation2]  }
  0x33   : > { %p2259_p1 = scmp.ne.s32.totalorder %s2472_s6, %s2258_s15  ;;  %s2263_s27 = sshll.u32 %s2346_s23, 4  ;;  %s2264_s27 = int_to_ptr.vmem [resolvable:$false] %s2263_s27 }
  0x34   : > { %s2265_s28 = scalar_lea.vmem %s2264_s27, 16384  ;;  %p2266_p9 = scmp.lt.s32.totalorder %s2472_s6, %s2264_s27 }
  0x35   : > { %p2261_p6 = pnand %p2259_p1, %p2247_p7  ;;  %p2267_p3 = scmp.lt.s32.totalorder %s2265_s28, %s2258_s15 }
  0x37   : > { %p2262_p5 = pneg %p2261_p6  ;;  %p2268_p4 = por %p2267_p3, %p2266_p9 }
  0x39   : > { %p2269_p8 = pnand %p2268_p4, %p2262_p5 }
  0x3b   : > { %2272 = shalt.err (!%p2269_p8)
}
  0x3c   : > { %s2347_s9 = smov 128   ;;  %s2348_s10 = smov 8  }
  0x3d   : > { %1969 = dma.hbm_to_vmem [thread:$0]  (!%p2468_p11), %s2466_s29, 8192, %s2472_s6, %s2474_s8, %s2347_s9, %s2347_s9, %s2348_s10  }
  0x3e   : > { %p3589_p1 = scmp.ne.s32.totalorder %s3584_s26, 0 }
  0x40   : > { %221 = sbr.rel (%p3589_p1) target bundleno = 730 (0x2da), region = 40 }
  0x45   : > { %s2498_s11 = sand.u32 1, %s2333_s19   ;;  %p3590_p4 = scmp.ne.s32.totalorder %s3582_s24, 0 }
  0x46   : > { %s1797_s12 = sshll.u32 %s2498_s11, 9  ;;  %s224_s16 = scalar_lea.sflag [#allocation3], %s2498_s11 }
  0x47   : > { %s2504_s17 = scalar_lea.vmem [#allocation2], %s1797_s12 }
  0x48   : > { %2316 = dma.done.wait (%p3590_p4), %s224_s16, 8192  }
  0x49   : > { %2318 = vsyncadd (%p3590_p4), %s224_s16, 4294959104  ;;  %p3591_p6 = scmp.eq.s32.totalorder %s2403_s22, 0 }
  0x4b   : > { %2320 = dma.done.wait (%p3591_p6), [#allocation6], 1024   ;;  %p3592_p8 = pmov %p3591_p6 }
  0x4c   : > { %v2515_v0 = vld [vmem:[%s2504_s17] sm:$0xff]  ;;  %v2523_v2 = vld [vmem:[%s2504_s17 + $0x8] sm:$0xff]  ;;  %v2531_v4 = vld [vmem:[%s2504_s17 + $0x10] sm:$0xff]  ;;  %s3298_s9 = scalar_lea.vmem [#allocation7], %s1797_s12  ;;  %s1817_s10 = sshll.u32 %s2403_s22, 13 }
  0x4d   : > { %2322 = vsyncadd (%p3592_p8), [#allocation6], 4294966272  ;;  %v2518_v1 = vld [vmem:[%s2504_s17 + $0x100] sm:$0xff]  ;;  %327 = vadd.xlane.f32.xlu0 %v2515_v0  ;;  %v2526_v3 = vld [vmem:[%s2504_s17 + $0x108] sm:$0xff]  ;;  %s1706_s12 = sshll.u32 %s3298_s9, 4  ;;  %s3491_s26 = scalar_lea.hbm %s3544_s5, %s1817_s10  ;;  %s3493_s12 = int_to_ptr.vmem [resolvable:$true] %s1706_s12 }
  0x4e   : > { %391 = vadd.xlane.f32.xlu1 %v2518_v1  ;;  %v2534_v5 = vld [vmem:[%s2504_s17 + $0x18] sm:$0xff]  ;;  %v2539_v6 = vld [vmem:[%s2504_s17 + $0x110] sm:$0xff]  ;;  %v2547_v8 = vld [vmem:[%s2504_s17 + $0x20] sm:$0xff]  ;;  %s1693_s22 = scalar_lea.sflag [#allocation4], %s2498_s11  ;;  %s2273_s29 = scalar_lea.vmem %s3493_s12, 8192 }
  0x4f   : > { %v2542_v7 = vld [vmem:[%s2504_s17 + $0x118] sm:$0xff]  ;;  %v2550_v9 = vld [vmem:[%s2504_s17 + $0x28] sm:$0xff]  ;;  %v2555_v10 = vld [vmem:[%s2504_s17 + $0x120] sm:$0xff]  ;;  %p2274_p3 = scmp.ne.s32.totalorder %s3493_s12, %s2273_s29  ;;  %p3659_p11 = scmp.ne.s32.totalorder %s3587_s14, 0 }
  0x50   : > { %v2558_v11 = vld [vmem:[%s2504_s17 + $0x128] sm:$0xff]  ;;  %v2561_v12 = vld [vmem:[%s2504_s17 + $0x30] sm:$0xff]  ;;  %v2566_v13 = vld [vmem:[%s2504_s17 + $0x38] sm:$0xff]  ;;  %s2349_s6 = smov [#allocation7]  }
  0x51   : > { %329 = vadd.xlane.f32.xlu0 %v2523_v2  ;;  %v2569_v14 = vld [vmem:[%s2504_s17 + $0x130] sm:$0xff]  ;;  %v2574_v15 = vld [vmem:[%s2504_s17 + $0x138] sm:$0xff]  ;;  %v2579_v16 = vld [vmem:[%s2504_s17 + $0x40] sm:$0xff]  ;;  %p2275_p7 = pnand %p2274_p3, %p3659_p11  ;;  %s2277_s7 = sshll.u32 %s2349_s6, 4  ;;  %s2278_s7 = int_to_ptr.vmem [resolvable:$false] %s2277_s7 }
  0x52   : > { %393 = vadd.xlane.f32.xlu1 %v2526_v3  ;;  %v2582_v17 = vld [vmem:[%s2504_s17 + $0x48] sm:$0xff]  ;;  %v2587_v18 = vld [vmem:[%s2504_s17 + $0x140] sm:$0xff]  ;;  %v2595_v20 = vld [vmem:[%s2504_s17 + $0x50] sm:$0xff]  ;;  %s2279_s8 = scalar_lea.vmem %s2278_s7, 16384  ;;  %p2280_p10 = scmp.lt.s32.totalorder %s3493_s12, %s2278_s7 }
  0x53   : > { %v2590_v19 = vld [vmem:[%s2504_s17 + $0x148] sm:$0xff]  ;;  %v2598_v21 = vld [vmem:[%s2504_s17 + $0x58] sm:$0xff]  ;;  %v2603_v22 = vld [vmem:[%s2504_s17 + $0x150] sm:$0xff]  ;;  %p2276_p12 = pneg %p2275_p7  ;;  %p2281_p2 = scmp.lt.s32.totalorder %s2279_s8, %s2273_s29 }
  0x54   : > { %v2606_v23 = vld [vmem:[%s2504_s17 + $0x158] sm:$0xff]  ;;  %v2611_v24 = vld [vmem:[%s2504_s17 + $0x60] sm:$0xff]  ;;  %v2614_v25 = vld [vmem:[%s2504_s17 + $0x68] sm:$0xff] }
  0x55   : > { %331 = vadd.xlane.f32.xlu0 %v2531_v4  ;;  %v2619_v26 = vld [vmem:[%s2504_s17 + $0x160] sm:$0xff]  ;;  %v2622_v27 = vld [vmem:[%s2504_s17 + $0x168] sm:$0xff]  ;;  %v2627_v28 = vld [vmem:[%s2504_s17 + $0x70] sm:$0xff]  ;;  %p2282_p13 = por %p2281_p2, %p2280_p10 }
  0x56   : > { %333 = vadd.xlane.f32.xlu1 %v2534_v5  ;;  %v2630_v29 = vld [vmem:[%s2504_s17 + $0x78] sm:$0xff]  ;;  %v2635_v30 = vld [vmem:[%s2504_s17 + $0x170] sm:$0xff]  ;;  %v2643_v32 = vld [vmem:[%s2504_s17 + $0x80] sm:$0xff] }
  0x57   : > { %v2638_v31 = vld [vmem:[%s2504_s17 + $0x178] sm:$0xff]  ;;  %v2646_v33 = vld [vmem:[%s2504_s17 + $0x88] sm:$0xff]  ;;  %v2651_v34 = vld [vmem:[%s2504_s17 + $0x180] sm:$0xff]  ;;  %p2283_p0 = pnand %p2282_p13, %p2276_p12 }
  0x58   : > { %v2654_v35 = vld [vmem:[%s2504_s17 + $0x188] sm:$0xff]  ;;  %v2659_v36 = vld [vmem:[%s2504_s17 + $0x90] sm:$0xff]  ;;  %v2662_v37 = vld [vmem:[%s2504_s17 + $0x98] sm:$0xff] }
  0x59   : > { %395 = vadd.xlane.f32.xlu0 %v2539_v6  ;;  %v2667_v38 = vld [vmem:[%s2504_s17 + $0x190] sm:$0xff]  ;;  %v2670_v39 = vld [vmem:[%s2504_s17 + $0x198] sm:$0xff]  ;;  %v2675_v40 = vld [vmem:[%s2504_s17 + $0xa0] sm:$0xff] }
  0x5a   : > { %397 = vadd.xlane.f32.xlu1 %v2542_v7  ;;  %v2678_v41 = vld [vmem:[%s2504_s17 + $0xa8] sm:$0xff]  ;;  %v2683_v42 = vld [vmem:[%s2504_s17 + $0x1a0] sm:$0xff]  ;;  %v2691_v44 = vld [vmem:[%s2504_s17 + $0xb0] sm:$0xff] }
  0x5b   : > { %v2686_v43 = vld [vmem:[%s2504_s17 + $0x1a8] sm:$0xff]  ;;  %v2694_v45 = vld [vmem:[%s2504_s17 + $0xb8] sm:$0xff]  ;;  %v2699_v46 = vld [vmem:[%s2504_s17 + $0x1b0] sm:$0xff] }
  0x5c   : > { %v2702_v47 = vld [vmem:[%s2504_s17 + $0x1b8] sm:$0xff]  ;;  %v2707_v48 = vld [vmem:[%s2504_s17 + $0xc0] sm:$0xff]  ;;  %v2710_v49 = vld [vmem:[%s2504_s17 + $0xc8] sm:$0xff] }
  0x5d   : > { %335 = vadd.xlane.f32.xlu0 %v2547_v8  ;;  %v2715_v50 = vld [vmem:[%s2504_s17 + $0x1c0] sm:$0xff]  ;;  %v2718_v51 = vld [vmem:[%s2504_s17 + $0x1c8] sm:$0xff]  ;;  %v2723_v52 = vld [vmem:[%s2504_s17 + $0xd0] sm:$0xff] }
  0x5e   : > { %337 = vadd.xlane.f32.xlu1 %v2550_v9  ;;  %3593 = vst [vmem:[#allocation11_spill] sm:$0xff] %v2718_v51  ;;  %3594 = vst [vmem:[#allocation12_spill] sm:$0xff] %v2723_v52  ;;  %v2726_v53 = vld [vmem:[%s2504_s17 + $0xd8] sm:$0xff]  ;;  %v2731_v54 = vld [vmem:[%s2504_s17 + $0x1d0] sm:$0xff] }
  0x5f   : > { %3595 = vst [vmem:[#allocation13_spill] sm:$0xff] %v2726_v53  ;;  %3596 = vst [vmem:[#allocation14_spill] sm:$0xff] %v2731_v54  ;;  %v2734_v55 = vld [vmem:[%s2504_s17 + $0x1d8] sm:$0xff]  ;;  %v2739_v56 = vld [vmem:[%s2504_s17 + $0xe0] sm:$0xff] }
  0x60   : > { %3597 = vst [vmem:[#allocation15_spill] sm:$0xff] %v2734_v55  ;;  %3598 = vst [vmem:[#allocation16_spill] sm:$0xff] %v2739_v56  ;;  %v2742_v57 = vld [vmem:[%s2504_s17 + $0xe8] sm:$0xff]  ;;  %v2747_v58 = vld [vmem:[%s2504_s17 + $0x1e0] sm:$0xff] }
  0x61   : > { %399 = vadd.xlane.f32.xlu0 %v2555_v10  ;;  %3599 = vst [vmem:[#allocation17_spill] sm:$0xff] %v2742_v57  ;;  %3600 = vst [vmem:[#allocation18_spill] sm:$0xff] %v2747_v58  ;;  %v2750_v59 = vld [vmem:[%s2504_s17 + $0x1e8] sm:$0xff]  ;;  %v2755_v60 = vld [vmem:[%s2504_s17 + $0xf0] sm:$0xff] }
  0x62   : > { %401 = vadd.xlane.f32.xlu1 %v2558_v11  ;;  %3601 = vst [vmem:[#allocation19_spill] sm:$0xff] %v2750_v59  ;;  %3602 = vst [vmem:[#allocation20_spill] sm:$0xff] %v2755_v60  ;;  %v2758_v61 = vld [vmem:[%s2504_s17 + $0xf8] sm:$0xff]  ;;  %v2763_v62 = vld [vmem:[%s2504_s17 + $0x1f0] sm:$0xff] }
  0x63   : > { %3603 = vst [vmem:[#allocation21_spill] sm:$0xff] %v2758_v61  ;;  %v2766_v63 = vld [vmem:[%s2504_s17 + $0x1f8] sm:$0xff] }
  0x64   : > { %3604 = vst [vmem:[#allocation22_spill] sm:$0xff] %v2766_v63 }
  0x65   : > { %339 = vadd.xlane.f32.xlu0 %v2561_v12 }
  0x66   : > { %341 = vadd.xlane.f32.xlu1 %v2566_v13 }
  0x69   : > { %403 = vadd.xlane.f32.xlu0 %v2569_v14 }
  0x6a   : > { %405 = vadd.xlane.f32.xlu1 %v2574_v15 }
  0x6d   : > { %343 = vadd.xlane.f32.xlu0 %v2579_v16 }
  0x6e   : > { %345 = vadd.xlane.f32.xlu1 %v2582_v17 }
  0x71   : > { %407 = vadd.xlane.f32.xlu0 %v2587_v18 }
  0x72   : > { %409 = vadd.xlane.f32.xlu1 %v2590_v19 }
  0x75   : > { %347 = vadd.xlane.f32.xlu0 %v2595_v20 }
  0x76   : > { %349 = vadd.xlane.f32.xlu1 %v2598_v21 }
  0x79   : > { %411 = vadd.xlane.f32.xlu0 %v2603_v22 }
  0x7a   : > { %413 = vadd.xlane.f32.xlu1 %v2606_v23 }
  0x7d   : > { %351 = vadd.xlane.f32.xlu0 %v2611_v24 }
  0x7e   : > { %353 = vadd.xlane.f32.xlu1 %v2614_v25 }
  0x81   : > { %415 = vadd.xlane.f32.xlu0 %v2619_v26 }
  0x82   : > { %417 = vadd.xlane.f32.xlu1 %v2622_v27 }
  0x85   : > { %355 = vadd.xlane.f32.xlu0 %v2627_v28 }
  0x86   : > { %357 = vadd.xlane.f32.xlu1 %v2630_v29 }
  0x89   : > { %419 = vadd.xlane.f32.xlu0 %v2635_v30 }
  0x8a   : > { %421 = vadd.xlane.f32.xlu1 %v2638_v31 }
  0x8d   : > { %359 = vadd.xlane.f32.xlu0 %v2643_v32 }
  0x8e   : > { %361 = vadd.xlane.f32.xlu1 %v2646_v33 }
  0x91   : > { %423 = vadd.xlane.f32.xlu0 %v2651_v34 }
  0x92   : > { %425 = vadd.xlane.f32.xlu1 %v2654_v35 }
  0x95   : > { %363 = vadd.xlane.f32.xlu0 %v2659_v36 }
  0x96   : > { %365 = vadd.xlane.f32.xlu1 %v2662_v37 }
  0x99   : > { %427 = vadd.xlane.f32.xlu0 %v2667_v38 }
  0x9a   : > { %429 = vadd.xlane.f32.xlu1 %v2670_v39 }
  0x9d   : > { %367 = vadd.xlane.f32.xlu0 %v2675_v40 }
  0x9e   : > { %369 = vadd.xlane.f32.xlu1 %v2678_v41 }
  0xa1   : > { %431 = vadd.xlane.f32.xlu0 %v2683_v42 }
  0xa2   : > { %433 = vadd.xlane.f32.xlu1 %v2686_v43 }
  0xa5   : > { %371 = vadd.xlane.f32.xlu0 %v2691_v44 }
  0xa6   : > { %373 = vadd.xlane.f32.xlu1 %v2694_v45 }
  0xa9   : > { %435 = vadd.xlane.f32.xlu0 %v2699_v46 }
  0xaa   : > { %437 = vadd.xlane.f32.xlu1 %v2702_v47 }
  0xad   : > { %375 = vadd.xlane.f32.xlu0 %v2707_v48 }
  0xae   : > { %377 = vadd.xlane.f32.xlu1 %v2710_v49 }
  0xb1   : > { %439 = vadd.xlane.f32.xlu0 %v2715_v50 }
  0xb2   : > { %441 = vadd.xlane.f32.xlu1 %v2718_v51 }
  0xb5   : > { %379 = vadd.xlane.f32.xlu0 %v2723_v52 }
  0xb6   : > { %381 = vadd.xlane.f32.xlu1 %v2726_v53 }
  0xb9   : > { %443 = vadd.xlane.f32.xlu0 %v2731_v54 }
  0xba   : > { %445 = vadd.xlane.f32.xlu1 %v2734_v55 }
  0xbd   : > { %383 = vadd.xlane.f32.xlu0 %v2739_v56 }
  0xbe   : > { %385 = vadd.xlane.f32.xlu1 %v2742_v57 }
  0xc1   : > { %447 = vadd.xlane.f32.xlu0 %v2747_v58 }
  0xc2   : > { %449 = vadd.xlane.f32.xlu1 %v2750_v59 }
  0xc5   : > { %387 = vadd.xlane.f32.xlu0 %v2755_v60 }
  0xc6   : > { %389 = vadd.xlane.f32.xlu1 %v2758_v61 }
  0xc9   : > { %451 = vadd.xlane.f32.xlu0 %v2763_v62 }
  0xca   : > { %453 = vadd.xlane.f32.xlu1 %v2766_v63 }
  0xd6   : > { %v328_v57 = vpop.xlane.xlu0 %327 }
  0xd7   : > { %v392_v58 = vpop.xlane.xlu1 %391  ;;  %v456_v56 = vmul.f32 0.0078125, %v328_v57 }
  0xd8   : > { %v488_v59 = vmul.f32 0.0078125, %v392_v58 }
  0xd9   : > { %v2771_v55 = vsub.f32 %v2515_v0, %v456_v56 }
  0xda   : > { %v2774_v54 = vsub.f32 %v2518_v1, %v488_v59  ;;  %v330_v60 = vpop.xlane.xlu0 %329 }
  0xdb   : > { %v394_v61 = vpop.xlane.xlu1 %393  ;;  %v457_v53 = vmul.f32 0.0078125, %v330_v60  ;;  %v584_v52 = vmul.f32 %v2771_v55, %v2771_v55 }
  0xdc   : > { %3605 = vst [vmem:[#allocation23_spill] sm:$0xff] %v2774_v54  ;;  %v489_v51 = vmul.f32 0.0078125, %v394_v61  ;;  %v616_v63 = vmul.f32 %v2774_v54, %v2774_v54 }
  0xdd   : > { %648 = vadd.xlane.f32.xlu0 %v584_v52  ;;  %v2781_v57 = vsub.f32 %v2523_v2, %v457_v53 }
  0xde   : > { %v2784_v0 = vsub.f32 %v2526_v3, %v489_v51  ;;  %v332_v56 = vpop.xlane.xlu0 %331 }
  0xdf   : > { %v334_v1 = vpop.xlane.xlu1 %333  ;;  %v458_v58 = vmul.f32 0.0078125, %v332_v56  ;;  %v585_v59 = vmul.f32 %v2781_v57, %v2781_v57 }
  0xe0   : > { %v459_v60 = vmul.f32 0.0078125, %v334_v1  ;;  %v617_v52 = vmul.f32 %v2784_v0, %v2784_v0 }
  0xe1   : > { %712 = vadd.xlane.f32.xlu0 %v616_v63  ;;  %650 = vadd.xlane.f32.xlu1 %v585_v59  ;;  %v2791_v61 = vsub.f32 %v2531_v4, %v458_v58 }
  0xe2   : > { %v2794_v2 = vsub.f32 %v2534_v5, %v459_v60  ;;  %v396_v3 = vpop.xlane.xlu0 %395 }
  0xe3   : > { %v398_v51 = vpop.xlane.xlu1 %397  ;;  %v490_v53 = vmul.f32 0.0078125, %v396_v3  ;;  %v586_v56 = vmul.f32 %v2791_v61, %v2791_v61 }
  0xe4   : > { %v491_v54 = vmul.f32 0.0078125, %v398_v51  ;;  %v587_v63 = vmul.f32 %v2794_v2, %v2794_v2 }
  0xe5   : > { %714 = vadd.xlane.f32.xlu1 %v617_v52  ;;  %652 = vadd.xlane.f32.xlu0 %v586_v56  ;;  %v2801_v1 = vsub.f32 %v2539_v6, %v490_v53 }
  0xe6   : > { %v2804_v4 = vsub.f32 %v2542_v7, %v491_v54  ;;  %v336_v5 = vpop.xlane.xlu0 %335 }
  0xe7   : > { %3606 = vst [vmem:[#allocation24_spill] sm:$0xff] %v2801_v1  ;;  %v338_v58 = vpop.xlane.xlu1 %337  ;;  %v460_v59 = vmul.f32 0.0078125, %v336_v5  ;;  %v618_v60 = vmul.f32 %v2801_v1, %v2801_v1  ;;  %v2017_v1 = vld [vmem:[#allocation5 + $0x38] sm:$0xff]  }
  0xe8   : > { %v461_v3 = vmul.f32 0.0078125, %v338_v58  ;;  %v619_v52 = vmul.f32 %v2804_v4, %v2804_v4  ;;  %1858 = vmatprep.subr.bf16.mxu0 %v2017_v1  ;;  %1938 = vmatprep.subr.bf16.mxu1 %v2017_v1 }
  0xe9   : > { %654 = vadd.xlane.f32.xlu1 %v587_v63  ;;  %716 = vadd.xlane.f32.xlu0 %v618_v60  ;;  %v2811_v51 = vsub.f32 %v2547_v8, %v460_v59 }
  0xea   : > { %v2814_v6 = vsub.f32 %v2550_v9, %v461_v3  ;;  %v400_v7 = vpop.xlane.xlu0 %399  ;;  %1859 = vmatpush3.bf16.msra.mxu0 %v2017_v1  ;;  %1946 = vmatpush3.bf16.msra.mxu1 %v2017_v1 }
  0xeb   : > { %v402_v54 = vpop.xlane.xlu1 %401  ;;  %v492_v53 = vmul.f32 0.0078125, %v400_v7  ;;  %v588_v56 = vmul.f32 %v2811_v51, %v2811_v51 }
  0xec   : > { %v493_v5 = vmul.f32 0.0078125, %v402_v54  ;;  %v589_v63 = vmul.f32 %v2814_v6, %v2814_v6 }
  0xed   : > { %718 = vadd.xlane.f32.xlu1 %v619_v52  ;;  %656 = vadd.xlane.f32.xlu0 %v588_v56  ;;  %v2821_v58 = vsub.f32 %v2555_v10, %v492_v53  ;;  %v2018_v52 = vld [vmem:[#allocation5 + $0x30] sm:$0xff]  }
  0xee   : > { %v2824_v8 = vsub.f32 %v2558_v11, %v493_v5  ;;  %v340_v9 = vpop.xlane.xlu0 %339  ;;  %1860 = vmatprep.subr.bf16.mxu0 %v2018_v52  ;;  %1939 = vmatprep.subr.bf16.mxu1 %v2018_v52 }
  0xef   : > { %v342_v59 = vpop.xlane.xlu1 %341  ;;  %v462_v60 = vmul.f32 0.0078125, %v340_v9  ;;  %v620_v3 = vmul.f32 %v2821_v58, %v2821_v58  ;;  %1861 = vmatpush3.bf16.msra.mxu0 %v2018_v52  ;;  %1947 = vmatpush3.bf16.msra.mxu1 %v2018_v52 }
  0xf0   : > { %v463_v7 = vmul.f32 0.0078125, %v342_v59  ;;  %v621_v10 = vmul.f32 %v2824_v8, %v2824_v8 }
  0xf1   : > { %658 = vadd.xlane.f32.xlu1 %v589_v63  ;;  %720 = vadd.xlane.f32.xlu0 %v620_v3  ;;  %v2831_v11 = vsub.f32 %v2561_v12, %v462_v60  ;;  %v2019_v63 = vld [vmem:[#allocation5 + $0x28] sm:$0xff]  }
  0xf2   : > { %v2834_v54 = vsub.f32 %v2566_v13, %v463_v7  ;;  %v404_v53 = vpop.xlane.xlu0 %403  ;;  %1862 = vmatprep.subr.bf16.mxu0 %v2019_v63  ;;  %1940 = vmatprep.subr.bf16.mxu1 %v2019_v63 }
  0xf3   : > { %v406_v56 = vpop.xlane.xlu1 %405  ;;  %v494_v5 = vmul.f32 0.0078125, %v404_v53  ;;  %v590_v1 = vmul.f32 %v2831_v11, %v2831_v11  ;;  %1863 = vmatpush3.bf16.msra.mxu0 %v2019_v63  ;;  %1948 = vmatpush3.bf16.msra.mxu1 %v2019_v63 }
  0xf4   : > { %v495_v9 = vmul.f32 0.0078125, %v406_v56  ;;  %v591_v12 = vmul.f32 %v2834_v54, %v2834_v54 }
  0xf5   : > { %722 = vadd.xlane.f32.xlu1 %v621_v10  ;;  %660 = vadd.xlane.f32.xlu0 %v590_v1  ;;  %v2841_v13 = vsub.f32 %v2569_v14, %v494_v5  ;;  %v2020_v10 = vld [vmem:[#allocation5 + $0x20] sm:$0xff]  }
  0xf6   : > { %v2844_v59 = vsub.f32 %v2574_v15, %v495_v9  ;;  %v344_v60 = vpop.xlane.xlu0 %343  ;;  %1864 = vmatprep.subr.bf16.mxu0 %v2020_v10  ;;  %1941 = vmatprep.subr.bf16.mxu1 %v2020_v10 }
  0xf7   : > { %v346_v3 = vpop.xlane.xlu1 %345  ;;  %v464_v7 = vmul.f32 0.0078125, %v344_v60  ;;  %v622_v52 = vmul.f32 %v2841_v13, %v2841_v13  ;;  %1865 = vmatpush3.bf16.msra.mxu0 %v2020_v10  ;;  %1949 = vmatpush3.bf16.msra.mxu1 %v2020_v10 }
  0xf8   : > { %v465_v53 = vmul.f32 0.0078125, %v346_v3  ;;  %v623_v14 = vmul.f32 %v2844_v59, %v2844_v59 }
  0xf9   : > { %662 = vadd.xlane.f32.xlu1 %v591_v12  ;;  %724 = vadd.xlane.f32.xlu0 %v622_v52  ;;  %v2851_v15 = vsub.f32 %v2579_v16, %v464_v7  ;;  %v2021_v12 = vld [vmem:[#allocation5 + $0x18] sm:$0xff]  }
  0xfa   : > { %v2854_v56 = vsub.f32 %v2582_v17, %v465_v53  ;;  %v408_v5 = vpop.xlane.xlu0 %407  ;;  %1866 = vmatprep.subr.bf16.mxu0 %v2021_v12  ;;  %1942 = vmatprep.subr.bf16.mxu1 %v2021_v12 }
  0xfb   : > { %v410_v1 = vpop.xlane.xlu1 %409  ;;  %v496_v9 = vmul.f32 0.0078125, %v408_v5  ;;  %v592_v63 = vmul.f32 %v2851_v15, %v2851_v15  ;;  %1867 = vmatpush3.bf16.msra.mxu0 %v2021_v12  ;;  %1950 = vmatpush3.bf16.msra.mxu1 %v2021_v12 }
  0xfc   : > { %v497_v60 = vmul.f32 0.0078125, %v410_v1  ;;  %v593_v16 = vmul.f32 %v2854_v56, %v2854_v56 }
  0xfd   : > { %726 = vadd.xlane.f32.xlu1 %v623_v14  ;;  %664 = vadd.xlane.f32.xlu0 %v592_v63  ;;  %v2861_v17 = vsub.f32 %v2587_v18, %v496_v9  ;;  %v2022_v14 = vld [vmem:[#allocation5 + $0x10] sm:$0xff]  }
  0xfe   : > { %v2864_v3 = vsub.f32 %v2590_v19, %v497_v60  ;;  %v348_v7 = vpop.xlane.xlu0 %347  ;;  %1868 = vmatprep.subr.bf16.mxu0 %v2022_v14  ;;  %1943 = vmatprep.subr.bf16.mxu1 %v2022_v14 }
  0xff   : > { %v350_v52 = vpop.xlane.xlu1 %349  ;;  %v466_v53 = vmul.f32 0.0078125, %v348_v7  ;;  %v624_v10 = vmul.f32 %v2861_v17, %v2861_v17  ;;  %1869 = vmatpush3.bf16.msra.mxu0 %v2022_v14  ;;  %1951 = vmatpush3.bf16.msra.mxu1 %v2022_v14 }
 0x100   : > { %v467_v5 = vmul.f32 0.0078125, %v350_v52  ;;  %v625_v18 = vmul.f32 %v2864_v3, %v2864_v3 }
 0x101   : > { %666 = vadd.xlane.f32.xlu1 %v593_v16  ;;  %728 = vadd.xlane.f32.xlu0 %v624_v10  ;;  %v2871_v19 = vsub.f32 %v2595_v20, %v466_v53  ;;  %v2023_v16 = vld [vmem:[#allocation5 + $0x8] sm:$0xff]  }
 0x102   : > { %v2874_v1 = vsub.f32 %v2598_v21, %v467_v5  ;;  %v412_v9 = vpop.xlane.xlu0 %411  ;;  %1870 = vmatprep.subr.bf16.mxu0 %v2023_v16  ;;  %1944 = vmatprep.subr.bf16.mxu1 %v2023_v16 }
 0x103   : > { %v414_v63 = vpop.xlane.xlu1 %413  ;;  %v498_v60 = vmul.f32 0.0078125, %v412_v9  ;;  %v594_v12 = vmul.f32 %v2871_v19, %v2871_v19  ;;  %1871 = vmatpush3.bf16.msra.mxu0 %v2023_v16  ;;  %1952 = vmatpush3.bf16.msra.mxu1 %v2023_v16 }
 0x104   : > { %v499_v7 = vmul.f32 0.0078125, %v414_v63  ;;  %v595_v20 = vmul.f32 %v2874_v1, %v2874_v1 }
 0x105   : > { %730 = vadd.xlane.f32.xlu1 %v625_v18  ;;  %668 = vadd.xlane.f32.xlu0 %v594_v12  ;;  %v2881_v21 = vsub.f32 %v2603_v22, %v498_v60  ;;  %v2024_v18 = vld [vmem:[#allocation5] sm:$0xff]  }
 0x106   : > { %v2884_v52 = vsub.f32 %v2606_v23, %v499_v7  ;;  %v352_v53 = vpop.xlane.xlu0 %351  ;;  %1872 = vmatprep.subr.bf16.mxu0 %v2024_v18  ;;  %1945 = vmatprep.subr.bf16.mxu1 %v2024_v18 }
 0x107   : > { %v354_v10 = vpop.xlane.xlu1 %353  ;;  %v468_v5 = vmul.f32 0.0078125, %v352_v53  ;;  %v626_v14 = vmul.f32 %v2881_v21, %v2881_v21  ;;  %1873 = vmatpush3.bf16.msra.mxu0 %v2024_v18  ;;  %1953 = vmatpush3.bf16.msra.mxu1 %v2024_v18 }
 0x108   : > { %v469_v9 = vmul.f32 0.0078125, %v354_v10  ;;  %v627_v22 = vmul.f32 %v2884_v52, %v2884_v52 }
 0x109   : > { %670 = vadd.xlane.f32.xlu1 %v595_v20  ;;  %732 = vadd.xlane.f32.xlu0 %v626_v14  ;;  %v2891_v23 = vsub.f32 %v2611_v24, %v468_v5 }
 0x10a   : > { %v2894_v63 = vsub.f32 %v2614_v25, %v469_v9  ;;  %v416_v60 = vpop.xlane.xlu0 %415 }
 0x10b   : > { %v418_v12 = vpop.xlane.xlu1 %417  ;;  %v500_v7 = vmul.f32 0.0078125, %v416_v60  ;;  %v596_v16 = vmul.f32 %v2891_v23, %v2891_v23 }
 0x10c   : > { %v501_v53 = vmul.f32 0.0078125, %v418_v12  ;;  %v597_v24 = vmul.f32 %v2894_v63, %v2894_v63 }
 0x10d   : > { %734 = vadd.xlane.f32.xlu1 %v627_v22  ;;  %672 = vadd.xlane.f32.xlu0 %v596_v16  ;;  %v2901_v20 = vsub.f32 %v2619_v26, %v500_v7 }
 0x10e   : > { %v2904_v25 = vsub.f32 %v2622_v27, %v501_v53  ;;  %v356_v10 = vpop.xlane.xlu0 %355 }
 0x10f   : > { %v358_v5 = vpop.xlane.xlu1 %357  ;;  %v470_v14 = vmul.f32 0.0078125, %v356_v10  ;;  %v628_v9 = vmul.f32 %v2901_v20, %v2901_v20 }
 0x110   : > { %v471_v60 = vmul.f32 0.0078125, %v358_v5  ;;  %v629_v18 = vmul.f32 %v2904_v25, %v2904_v25 }
 0x111   : > { %674 = vadd.xlane.f32.xlu1 %v597_v24  ;;  %736 = vadd.xlane.f32.xlu0 %v628_v9  ;;  %v2911_v22 = vsub.f32 %v2627_v28, %v470_v14 }
 0x112   : > { %v2914_v26 = vsub.f32 %v2630_v29, %v471_v60  ;;  %v420_v27 = vpop.xlane.xlu0 %419 }
 0x113   : > { %v422_v12 = vpop.xlane.xlu1 %421  ;;  %v502_v7 = vmul.f32 0.0078125, %v420_v27  ;;  %v598_v16 = vmul.f32 %v2911_v22, %v2911_v22 }
 0x114   : > { %v503_v53 = vmul.f32 0.0078125, %v422_v12  ;;  %v599_v28 = vmul.f32 %v2914_v26, %v2914_v26 }
 0x115   : > { %v2919_v10 = vsub.f32 %v2635_v30, %v502_v7  ;;  %738 = vadd.xlane.f32.xlu1 %v629_v18  ;;  %676 = vadd.xlane.f32.xlu0 %v598_v16 }
 0x116   : > { %v2922_v24 = vsub.f32 %v2638_v31, %v503_v53  ;;  %v360_v29 = vpop.xlane.xlu0 %359 }
 0x117   : > { %v362_v5 = vpop.xlane.xlu1 %361  ;;  %v472_v14 = vmul.f32 0.0078125, %v360_v29  ;;  %v630_v9 = vmul.f32 %v2919_v10, %v2919_v10 }
 0x118   : > { %v473_v60 = vmul.f32 0.0078125, %v362_v5  ;;  %v631_v31 = vmul.f32 %v2922_v24, %v2922_v24 }
 0x119   : > { %v2929_v27 = vsub.f32 %v2643_v32, %v472_v14  ;;  %678 = vadd.xlane.f32.xlu1 %v599_v28  ;;  %740 = vadd.xlane.f32.xlu0 %v630_v9 }
 0x11a   : > { %v2932_v30 = vsub.f32 %v2646_v33, %v473_v60  ;;  %v424_v18 = vpop.xlane.xlu0 %423 }
 0x11b   : > { %v426_v12 = vpop.xlane.xlu1 %425  ;;  %v504_v7 = vmul.f32 0.0078125, %v424_v18  ;;  %v600_v16 = vmul.f32 %v2929_v27, %v2929_v27 }
 0x11c   : > { %v505_v53 = vmul.f32 0.0078125, %v426_v12  ;;  %v601_v33 = vmul.f32 %v2932_v30, %v2932_v30 }
 0x11d   : > { %v2939_v29 = vsub.f32 %v2651_v34, %v504_v7  ;;  %742 = vadd.xlane.f32.xlu1 %v631_v31  ;;  %680 = vadd.xlane.f32.xlu0 %v600_v16 }
 0x11e   : > { %v2942_v32 = vsub.f32 %v2654_v35, %v505_v53  ;;  %v364_v28 = vpop.xlane.xlu0 %363 }
 0x11f   : > { %v366_v5 = vpop.xlane.xlu1 %365  ;;  %v474_v14 = vmul.f32 0.0078125, %v364_v28  ;;  %v632_v9 = vmul.f32 %v2939_v29, %v2939_v29 }
 0x120   : > { %v475_v60 = vmul.f32 0.0078125, %v366_v5  ;;  %v633_v35 = vmul.f32 %v2942_v32, %v2942_v32 }
 0x121   : > { %v2949_v18 = vsub.f32 %v2659_v36, %v474_v14  ;;  %682 = vadd.xlane.f32.xlu1 %v601_v33  ;;  %744 = vadd.xlane.f32.xlu0 %v632_v9 }
 0x122   : > { %v2952_v34 = vsub.f32 %v2662_v37, %v475_v60  ;;  %v428_v31 = vpop.xlane.xlu0 %427 }
 0x123   : > { %v430_v12 = vpop.xlane.xlu1 %429  ;;  %v506_v7 = vmul.f32 0.0078125, %v428_v31  ;;  %v602_v16 = vmul.f32 %v2949_v18, %v2949_v18 }
 0x124   : > { %v507_v53 = vmul.f32 0.0078125, %v430_v12  ;;  %v603_v37 = vmul.f32 %v2952_v34, %v2952_v34 }
 0x125   : > { %v2959_v28 = vsub.f32 %v2667_v38, %v506_v7  ;;  %746 = vadd.xlane.f32.xlu1 %v633_v35  ;;  %684 = vadd.xlane.f32.xlu0 %v602_v16 }
 0x126   : > { %v2962_v36 = vsub.f32 %v2670_v39, %v507_v53  ;;  %v368_v33 = vpop.xlane.xlu0 %367 }
 0x127   : > { %v370_v5 = vpop.xlane.xlu1 %369  ;;  %v476_v14 = vmul.f32 0.0078125, %v368_v33  ;;  %v634_v9 = vmul.f32 %v2959_v28, %v2959_v28 }
 0x128   : > { %v477_v60 = vmul.f32 0.0078125, %v370_v5  ;;  %v635_v39 = vmul.f32 %v2962_v36, %v2962_v36 }
 0x129   : > { %v2969_v31 = vsub.f32 %v2675_v40, %v476_v14  ;;  %686 = vadd.xlane.f32.xlu1 %v603_v37  ;;  %748 = vadd.xlane.f32.xlu0 %v634_v9 }
 0x12a   : > { %v2972_v38 = vsub.f32 %v2678_v41, %v477_v60  ;;  %v432_v35 = vpop.xlane.xlu0 %431 }
 0x12b   : > { %v434_v12 = vpop.xlane.xlu1 %433  ;;  %v508_v7 = vmul.f32 0.0078125, %v432_v35  ;;  %v604_v16 = vmul.f32 %v2969_v31, %v2969_v31 }
 0x12c   : > { %v509_v53 = vmul.f32 0.0078125, %v434_v12  ;;  %v605_v41 = vmul.f32 %v2972_v38, %v2972_v38 }
 0x12d   : > { %v2979_v33 = vsub.f32 %v2683_v42, %v508_v7  ;;  %750 = vadd.xlane.f32.xlu1 %v635_v39  ;;  %688 = vadd.xlane.f32.xlu0 %v604_v16 }
 0x12e   : > { %v2982_v40 = vsub.f32 %v2686_v43, %v509_v53  ;;  %v372_v37 = vpop.xlane.xlu0 %371 }
 0x12f   : > { %v374_v5 = vpop.xlane.xlu1 %373  ;;  %v478_v14 = vmul.f32 0.0078125, %v372_v37  ;;  %v636_v9 = vmul.f32 %v2979_v33, %v2979_v33 }
 0x130   : > { %v479_v60 = vmul.f32 0.0078125, %v374_v5  ;;  %v637_v43 = vmul.f32 %v2982_v40, %v2982_v40 }
 0x131   : > { %v2989_v35 = vsub.f32 %v2691_v44, %v478_v14  ;;  %690 = vadd.xlane.f32.xlu1 %v605_v41  ;;  %752 = vadd.xlane.f32.xlu0 %v636_v9 }
 0x132   : > { %v2992_v42 = vsub.f32 %v2694_v45, %v479_v60  ;;  %v436_v39 = vpop.xlane.xlu0 %435 }
 0x133   : > { %v438_v12 = vpop.xlane.xlu1 %437  ;;  %v510_v7 = vmul.f32 0.0078125, %v436_v39  ;;  %v606_v16 = vmul.f32 %v2989_v35, %v2989_v35 }
 0x134   : > { %3607 = vst [vmem:[#allocation25_spill] sm:$0xff] %v2992_v42  ;;  %v511_v53 = vmul.f32 0.0078125, %v438_v12  ;;  %v607_v45 = vmul.f32 %v2992_v42, %v2992_v42 }
 0x135   : > { %v2999_v37 = vsub.f32 %v2699_v46, %v510_v7  ;;  %754 = vadd.xlane.f32.xlu1 %v637_v43  ;;  %692 = vadd.xlane.f32.xlu0 %v606_v16 }
 0x136   : > { %v3002_v44 = vsub.f32 %v2702_v47, %v511_v53  ;;  %v376_v41 = vpop.xlane.xlu0 %375 }
 0x137   : > { %3608 = vst [vmem:[#allocation26_spill] sm:$0xff] %v2999_v37  ;;  %v378_v5 = vpop.xlane.xlu1 %377  ;;  %v480_v14 = vmul.f32 0.0078125, %v376_v41  ;;  %v638_v9 = vmul.f32 %v2999_v37, %v2999_v37 }
 0x138   : > { %3609 = vst [vmem:[#allocation27_spill] sm:$0xff] %v3002_v44  ;;  %v481_v60 = vmul.f32 0.0078125, %v378_v5  ;;  %v639_v47 = vmul.f32 %v3002_v44, %v3002_v44 }
 0x139   : > { %v3009_v39 = vsub.f32 %v2707_v48, %v480_v14  ;;  %694 = vadd.xlane.f32.xlu1 %v607_v45  ;;  %756 = vadd.xlane.f32.xlu0 %v638_v9  ;;  %v3613_v48 = vld [vmem:[#allocation11_spill] sm:$0xff] }
 0x13a   : > { %v3012_v46 = vsub.f32 %v2710_v49, %v481_v60  ;;  %v440_v43 = vpop.xlane.xlu0 %439 }
 0x13b   : > { %3610 = vst [vmem:[#allocation28_spill] sm:$0xff] %v3009_v39  ;;  %v442_v12 = vpop.xlane.xlu1 %441  ;;  %v512_v7 = vmul.f32 0.0078125, %v440_v43  ;;  %v608_v16 = vmul.f32 %v3009_v39, %v3009_v39  ;;  %v3615_v39 = vld [vmem:[#allocation12_spill] sm:$0xff] }
 0x13c   : > { %3611 = vst [vmem:[#allocation29_spill] sm:$0xff] %v3012_v46  ;;  %v513_v53 = vmul.f32 0.0078125, %v442_v12  ;;  %v609_v49 = vmul.f32 %v3012_v46, %v3012_v46 }
 0x13d   : > { %v3019_v41 = vsub.f32 %v2715_v50, %v512_v7  ;;  %758 = vadd.xlane.f32.xlu1 %v639_v47  ;;  %696 = vadd.xlane.f32.xlu0 %v608_v16  ;;  %v3617_v50 = vld [vmem:[#allocation13_spill] sm:$0xff] }
 0x13e   : > { %v3022_v45 = vsub.f32 %v3613_v48, %v513_v53  ;;  %v380_v5 = vpop.xlane.xlu0 %379 }
 0x13f   : > { %3612 = vst [vmem:[#allocation30_spill] sm:$0xff] %v3019_v41  ;;  %v382_v14 = vpop.xlane.xlu1 %381  ;;  %v482_v9 = vmul.f32 0.0078125, %v380_v5  ;;  %v640_v60 = vmul.f32 %v3019_v41, %v3019_v41  ;;  %v3619_v41 = vld [vmem:[#allocation14_spill] sm:$0xff] }
 0x140   : > { %3614 = vst [vmem:[#allocation11_spill] sm:$0xff] %v3022_v45  ;;  %v483_v43 = vmul.f32 0.0078125, %v382_v14  ;;  %v641_v7 = vmul.f32 %v3022_v45, %v3022_v45 }
 0x141   : > { %v3029_v12 = vsub.f32 %v3615_v39, %v482_v9  ;;  %698 = vadd.xlane.f32.xlu1 %v609_v49  ;;  %760 = vadd.xlane.f32.xlu0 %v640_v60  ;;  %v3621_v39 = vld [vmem:[#allocation15_spill] sm:$0xff] }
 0x142   : > { %v3032_v47 = vsub.f32 %v3617_v50, %v483_v43  ;;  %v444_v16 = vpop.xlane.xlu0 %443 }
 0x143   : > { %3616 = vst [vmem:[#allocation12_spill] sm:$0xff] %v3029_v12  ;;  %v446_v53 = vpop.xlane.xlu1 %445  ;;  %v514_v48 = vmul.f32 0.0078125, %v444_v16  ;;  %v610_v5 = vmul.f32 %v3029_v12, %v3029_v12  ;;  %v3623_v12 = vld [vmem:[#allocation16_spill] sm:$0xff] }
 0x144   : > { %3618 = vst [vmem:[#allocation13_spill] sm:$0xff] %v3032_v47  ;;  %v515_v46 = vmul.f32 0.0078125, %v446_v53  ;;  %v611_v9 = vmul.f32 %v3032_v47, %v3032_v47 }
 0x145   : > { %v3039_v14 = vsub.f32 %v3619_v41, %v514_v48  ;;  %762 = vadd.xlane.f32.xlu1 %v641_v7  ;;  %700 = vadd.xlane.f32.xlu0 %v610_v5  ;;  %v3625_v41 = vld [vmem:[#allocation17_spill] sm:$0xff] }
 0x146   : > { %v3042_v49 = vsub.f32 %v3621_v39, %v515_v46  ;;  %v384_v60 = vpop.xlane.xlu0 %383 }
 0x147   : > { %3620 = vst [vmem:[#allocation14_spill] sm:$0xff] %v3039_v14  ;;  %v386_v43 = vpop.xlane.xlu1 %385  ;;  %v484_v50 = vmul.f32 0.0078125, %v384_v60  ;;  %v642_v16 = vmul.f32 %v3039_v14, %v3039_v14  ;;  %v3627_v14 = vld [vmem:[#allocation18_spill] sm:$0xff] }
 0x148   : > { %3622 = vst [vmem:[#allocation15_spill] sm:$0xff] %v3042_v49  ;;  %v485_v45 = vmul.f32 0.0078125, %v386_v43  ;;  %v643_v46 = vmul.f32 %v3042_v49, %v3042_v49 }
 0x149   : > { %v3049_v53 = vsub.f32 %v3623_v12, %v484_v50  ;;  %702 = vadd.xlane.f32.xlu1 %v611_v9  ;;  %764 = vadd.xlane.f32.xlu0 %v642_v16  ;;  %v3629_v12 = vld [vmem:[#allocation19_spill] sm:$0xff] }
 0x14a   : > { %v3052_v7 = vsub.f32 %v3625_v41, %v485_v45  ;;  %v448_v48 = vpop.xlane.xlu0 %447 }
 0x14b   : > { %3624 = vst [vmem:[#allocation16_spill] sm:$0xff] %v3049_v53  ;;  %v450_v5 = vpop.xlane.xlu1 %449  ;;  %v516_v39 = vmul.f32 0.0078125, %v448_v48  ;;  %v612_v60 = vmul.f32 %v3049_v53, %v3049_v53  ;;  %v3631_v53 = vld [vmem:[#allocation20_spill] sm:$0xff] }
 0x14c   : > { %3626 = vst [vmem:[#allocation17_spill] sm:$0xff] %v3052_v7  ;;  %v517_v47 = vmul.f32 0.0078125, %v450_v5  ;;  %v613_v45 = vmul.f32 %v3052_v7, %v3052_v7 }
 0x14d   : > { %v3059_v43 = vsub.f32 %v3627_v14, %v516_v39  ;;  %766 = vadd.xlane.f32.xlu1 %v643_v46  ;;  %704 = vadd.xlane.f32.xlu0 %v612_v60  ;;  %v3633_v14 = vld [vmem:[#allocation21_spill] sm:$0xff] }
 0x14e   : > { %v3062_v9 = vsub.f32 %v3629_v12, %v517_v47  ;;  %v388_v50 = vpop.xlane.xlu0 %387 }
 0x14f   : > { %3628 = vst [vmem:[#allocation18_spill] sm:$0xff] %v3059_v43  ;;  %v390_v16 = vpop.xlane.xlu1 %389  ;;  %v486_v41 = vmul.f32 0.0078125, %v388_v50  ;;  %v644_v48 = vmul.f32 %v3059_v43, %v3059_v43 }
 0x150   : > { %3630 = vst [vmem:[#allocation19_spill] sm:$0xff] %v3062_v9  ;;  %v487_v49 = vmul.f32 0.0078125, %v390_v16  ;;  %v645_v47 = vmul.f32 %v3062_v9, %v3062_v9 }
 0x151   : > { %v3069_v5 = vsub.f32 %v3631_v53, %v486_v41  ;;  %706 = vadd.xlane.f32.xlu1 %v613_v45  ;;  %768 = vadd.xlane.f32.xlu0 %v644_v48  ;;  %v3636_v53 = vld [vmem:[#allocation22_spill] sm:$0xff] }
 0x152   : > { %v3072_v46 = vsub.f32 %v3633_v14, %v487_v49  ;;  %v452_v39 = vpop.xlane.xlu0 %451 }
 0x153   : > { %3632 = vst [vmem:[#allocation20_spill] sm:$0xff] %v3069_v5  ;;  %v454_v60 = vpop.xlane.xlu1 %453  ;;  %v518_v12 = vmul.f32 0.0078125, %v452_v39  ;;  %v614_v50 = vmul.f32 %v3069_v5, %v3069_v5 }
 0x154   : > { %3634 = vst [vmem:[#allocation21_spill] sm:$0xff] %v3072_v46  ;;  %v519_v7 = vmul.f32 0.0078125, %v454_v60  ;;  %v615_v49 = vmul.f32 %v3072_v46, %v3072_v46 }
 0x155   : > { %v3079_v16 = vsub.f32 %v2763_v62, %v518_v12  ;;  %770 = vadd.xlane.f32.xlu1 %v645_v47  ;;  %708 = vadd.xlane.f32.xlu0 %v614_v50 }
 0x156   : > { %v3082_v45 = vsub.f32 %v3636_v53, %v519_v7 }
 0x157   : > { %3635 = vst [vmem:[#allocation31_spill] sm:$0xff] %v3079_v16  ;;  %v646_v41 = vmul.f32 %v3079_v16, %v3079_v16 }
 0x158   : > { %3637 = vst [vmem:[#allocation22_spill] sm:$0xff] %v3082_v45  ;;  %v647_v48 = vmul.f32 %v3082_v45, %v3082_v45 }
 0x159   : > { %710 = vadd.xlane.f32.xlu1 %v615_v49  ;;  %772 = vadd.xlane.f32.xlu0 %v646_v41 }
 0x15d   : > { %774 = vadd.xlane.f32.xlu1 %v647_v48 }
 0x166   : > { %v649_v14 = vpop.xlane.xlu0 %648 }
 0x167   : > { %v776_v62 = vmul.f32 0.0078125, %v649_v14 }
 0x169   : > { %v840_v39 = vadd.f32 1e-06, %v776_v62 }
 0x16a   : > { %v651_v47 = vpop.xlane.xlu1 %650  ;;  %v713_v60 = vpop.xlane.xlu0 %712 }
 0x16b   : > { %2025 = vrsqrt.f32 %v840_v39  ;;  %v777_v7 = vmul.f32 0.0078125, %v651_v47  ;;  %v808_v12 = vmul.f32 0.0078125, %v713_v60 }
 0x16d   : > { %v841_v50 = vadd.f32 1e-06, %v777_v7  ;;  %v872_v53 = vadd.f32 1e-06, %v808_v12 }
 0x16e   : > { %v715_v46 = vpop.xlane.xlu1 %714  ;;  %v653_v5 = vpop.xlane.xlu0 %652 }
 0x16f   : > { %2027 = vrsqrt.f32 %v841_v50  ;;  %v809_v16 = vmul.f32 0.0078125, %v715_v46  ;;  %v778_v49 = vmul.f32 0.0078125, %v653_v5 }
 0x170   : > { %2029 = vrsqrt.f32 %v872_v53 }
 0x171   : > { %v873_v41 = vadd.f32 1e-06, %v809_v16  ;;  %v842_v9 = vadd.f32 1e-06, %v778_v49  ;;  %v3093_v16 = vld [vmem:[%s3540_s1] ss:$0 sm:$0xff] }
 0x172   : > { %v655_v45 = vpop.xlane.xlu1 %654  ;;  %v717_v48 = vpop.xlane.xlu0 %716 }
 0x173   : > { %2031 = vrsqrt.f32 %v873_v41  ;;  %v779_v14 = vmul.f32 0.0078125, %v655_v45  ;;  %v810_v62 = vmul.f32 0.0078125, %v717_v48 }
 0x174   : > { %2033 = vrsqrt.f32 %v842_v9 }
 0x175   : > { %v843_v43 = vadd.f32 1e-06, %v779_v14  ;;  %v874_v39 = vadd.f32 1e-06, %v810_v62 }
 0x176   : > { %v719_v47 = vpop.xlane.xlu1 %718  ;;  %v657_v60 = vpop.xlane.xlu0 %656 }
 0x177   : > { %2035 = vrsqrt.f32 %v843_v43  ;;  %v811_v7 = vmul.f32 0.0078125, %v719_v47  ;;  %v780_v12 = vmul.f32 0.0078125, %v657_v60  ;;  %v3638_v60 = vld [vmem:[#allocation23_spill] sm:$0xff] }
 0x178   : > { %v2026_v44 = vpop.eup %2025  ;;  %2037 = vrsqrt.f32 %v874_v39  ;;  %v3100_v39 = vld [vmem:[%s3541_s2] ss:$0 sm:$0xff] }
 0x179   : > { %v875_v46 = vadd.f32 1e-06, %v811_v7  ;;  %v844_v5 = vadd.f32 1e-06, %v780_v12  ;;  %v968_v45 = vmul.f32 %v2026_v44, %v2771_v55 }
 0x17a   : > { %v659_v50 = vpop.xlane.xlu1 %658  ;;  %v721_v9 = vpop.xlane.xlu0 %720 }
 0x17b   : > { %2039 = vrsqrt.f32 %v875_v46  ;;  %v781_v53 = vmul.f32 0.0078125, %v659_v50  ;;  %v812_v49 = vmul.f32 0.0078125, %v721_v9  ;;  %v1038_v43 = vmul.f32 %v3093_v16, %v968_v45 }
 0x17c   : > { %v2028_v41 = vpop.eup %2027  ;;  %2041 = vrsqrt.f32 %v844_v5 }
 0x17d   : > { %v2030_v48 = vpop.eup %2029  ;;  %v845_v14 = vadd.f32 1e-06, %v781_v53  ;;  %v876_v62 = vadd.f32 1e-06, %v812_v49  ;;  %v969_v47 = vmul.f32 %v2028_v41, %v2781_v57  ;;  %v1108_v50 = vadd.f32 %v3100_v39, %v1038_v43 }
 0x17e   : > { %v723_v55 = vpop.xlane.xlu1 %722  ;;  %v661_v44 = vpop.xlane.xlu0 %660  ;;  %v1000_v7 = vmul.f32 %v2030_v48, %v3638_v60 }
 0x17f   : > { %2043 = vrsqrt.f32 %v845_v14  ;;  %v813_v12 = vmul.f32 0.0078125, %v723_v55  ;;  %v782_v46 = vmul.f32 0.0078125, %v661_v44  ;;  %v1039_v5 = vmul.f32 %v3093_v16, %v969_v47 }
 0x180   : > { %v2032_v45 = vpop.eup %2031  ;;  %2045 = vrsqrt.f32 %v876_v62  ;;  %v1070_v48 = vmul.f32 %v3093_v16, %v1000_v7 }
 0x181   : > { %v2034_v9 = vpop.eup %2033  ;;  %v877_v53 = vadd.f32 1e-06, %v813_v12  ;;  %v846_v49 = vadd.f32 1e-06, %v782_v46  ;;  %v1109_v37 = vadd.f32 %v3100_v39, %v1039_v5  ;;  %v1001_v57 = vmul.f32 %v2032_v45, %v2784_v0 }
 0x182   : > { %v663_v41 = vpop.xlane.xlu1 %662  ;;  %v725_v42 = vpop.xlane.xlu0 %724  ;;  %v970_v14 = vmul.f32 %v2034_v9, %v2791_v61  ;;  %v1140_v61 = vadd.f32 %v3100_v39, %v1070_v48 }
 0x183   : > { %2047 = vrsqrt.f32 %v877_v53  ;;  %v783_v55 = vmul.f32 0.0078125, %v663_v41  ;;  %v814_v47 = vmul.f32 0.0078125, %v725_v42  ;;  %v1172_v44 = vpack.c.bf16 %v1109_v37, %v1108_v50  ;;  %v3639_v42 = vld [vmem:[#allocation24_spill] sm:$0xff] }
 0x184   : > { %v2036_v62 = vpop.eup %2035  ;;  %2049 = vrsqrt.f32 %v846_v49  ;;  %v1071_v43 = vmul.f32 %v3093_v16, %v1001_v57  ;;  %v1040_v60 = vmul.f32 %v3093_v16, %v970_v14 }
 0x185   : > { %v2038_v12 = vpop.eup %2037  ;;  %v847_v46 = vadd.f32 1e-06, %v783_v55  ;;  %v878_v5 = vadd.f32 1e-06, %v814_v47  ;;  %1874 = vmatprep.mubr.bf16.mxu0 %v1172_v44  ;;  %v971_v0 = vmul.f32 %v2036_v62, %v2794_v2 }
 0x186   : > { %v727_v45 = vpop.xlane.xlu1 %726  ;;  %v665_v7 = vpop.xlane.xlu0 %664  ;;  %v1141_v9 = vadd.f32 %v3100_v39, %v1071_v43  ;;  %v1002_v37 = vmul.f32 %v2038_v12, %v3639_v42  ;;  %v1110_v14 = vadd.f32 %v3100_v39, %v1040_v60 }
 0x187   : > { %2051 = vrsqrt.f32 %v847_v46  ;;  %v815_v50 = vmul.f32 0.0078125, %v727_v45  ;;  %v784_v53 = vmul.f32 0.0078125, %v665_v7  ;;  %v1041_v49 = vmul.f32 %v3093_v16, %v971_v0 }
 0x188   : > { %v2040_v57 = vpop.eup %2039  ;;  %2053 = vrsqrt.f32 %v878_v5  ;;  %v1188_v41 = vpack.c.bf16 %v1141_v9, %v1140_v61  ;;  %v1072_v12 = vmul.f32 %v3093_v16, %v1002_v37 }
 0x189   : > { %v2042_v55 = vpop.eup %2041  ;;  %v879_v2 = vadd.f32 1e-06, %v815_v50  ;;  %v848_v47 = vadd.f32 1e-06, %v784_v53  ;;  %v1111_v44 = vadd.f32 %v3100_v39, %v1041_v49  ;;  %v1003_v48 = vmul.f32 %v2040_v57, %v2804_v4 }
 0x18a   : > { %1906 = vmatprep.mubr.bf16.mxu1 %v1188_v41  ;;  %v667_v62 = vpop.xlane.xlu1 %666  ;;  %v729_v43 = vpop.xlane.xlu0 %728  ;;  %v972_v46 = vmul.f32 %v2042_v55, %v2811_v51  ;;  %v1142_v51 = vadd.f32 %v3100_v39, %v1072_v12 }
 0x18b   : > { %2055 = vrsqrt.f32 %v879_v2  ;;  %v785_v0 = vmul.f32 0.0078125, %v667_v62  ;;  %v816_v5 = vmul.f32 0.0078125, %v729_v43  ;;  %v1173_v45 = vpack.c.bf16 %v1111_v44, %v1110_v14 }
 0x18c   : > { %v2044_v7 = vpop.eup %2043  ;;  %2057 = vrsqrt.f32 %v848_v47  ;;  %v1073_v60 = vmul.f32 %v3093_v16, %v1003_v48  ;;  %v1042_v61 = vmul.f32 %v3093_v16, %v972_v46 }
 0x18d   : > { %v2046_v9 = vpop.eup %2045  ;;  %v849_v42 = vadd.f32 1e-06, %v785_v0  ;;  %v880_v4 = vadd.f32 1e-06, %v816_v5  ;;  %1875 = vmatmul.mubr.bf16.vlgmr.msra.gmra.mxu0 %v1173_v45  ;;  %v973_v50 = vmul.f32 %v2044_v7, %v2814_v6 }
 0x18e   : > { %v731_v53 = vpop.xlane.xlu1 %730  ;;  %v669_v37 = vpop.xlane.xlu0 %668  ;;  %v1143_v49 = vadd.f32 %v3100_v39, %v1073_v60  ;;  %v1004_v57 = vmul.f32 %v2046_v9, %v2821_v58  ;;  %v1112_v44 = vadd.f32 %v3100_v39, %v1042_v61 }
 0x18f   : > { %2059 = vrsqrt.f32 %v849_v42  ;;  %v817_v41 = vmul.f32 0.0078125, %v731_v53  ;;  %v786_v14 = vmul.f32 0.0078125, %v669_v37  ;;  %v1043_v55 = vmul.f32 %v3093_v16, %v973_v50 }
 0x190   : > { %v2048_v2 = vpop.eup %2047  ;;  %2061 = vrsqrt.f32 %v880_v4  ;;  %v1189_v47 = vpack.c.bf16 %v1143_v49, %v1142_v51  ;;  %v1074_v0 = vmul.f32 %v3093_v16, %v1004_v57 }
 0x191   : > { %v2050_v48 = vpop.eup %2049  ;;  %v881_v6 = vadd.f32 1e-06, %v817_v41  ;;  %v850_v62 = vadd.f32 1e-06, %v786_v14  ;;  %v1113_v43 = vadd.f32 %v3100_v39, %v1043_v55  ;;  %v1005_v12 = vmul.f32 %v2048_v2, %v2824_v8 }
 0x192   : > { %1907 = vmatmul.mubr.bf16.vlgmr.msra.gmra.mxu1 %v1189_v47  ;;  %v671_v46 = vpop.xlane.xlu1 %670  ;;  %v733_v58 = vpop.xlane.xlu0 %732  ;;  %v974_v5 = vmul.f32 %v2050_v48, %v2831_v11  ;;  %v1144_v11 = vadd.f32 %v3100_v39, %v1074_v0 }
 0x193   : > { %2063 = vrsqrt.f32 %v881_v6  ;;  %v787_v45 = vmul.f32 0.0078125, %v671_v46  ;;  %v818_v7 = vmul.f32 0.0078125, %v733_v58  ;;  %v1174_v60 = vpack.c.bf16 %v1113_v43, %v1112_v44 }
 0x194   : > { %v2052_v9 = vpop.eup %2051  ;;  %2065 = vrsqrt.f32 %v850_v62  ;;  %v1075_v61 = vmul.f32 %v3093_v16, %v1005_v12  ;;  %v1044_v42 = vmul.f32 %v3093_v16, %v974_v5 }
 0x195   : > { %v2054_v4 = vpop.eup %2053  ;;  %v851_v50 = vadd.f32 1e-06, %v787_v45  ;;  %v882_v8 = vadd.f32 1e-06, %v818_v7  ;;  %1878 = vmatprep.mubr.bf16.mxu0 %v1174_v60  ;;  %v975_v53 = vmul.f32 %v2052_v9, %v2834_v54 }
 0x196   : > { %v735_v37 = vpop.xlane.xlu1 %734  ;;  %v673_v51 = vpop.xlane.xlu0 %672  ;;  %v1145_v49 = vadd.f32 %v3100_v39, %v1075_v61  ;;  %v1006_v57 = vmul.f32 %v2054_v4, %v2841_v13  ;;  %v1114_v44 = vadd.f32 %v3100_v39, %v1044_v42 }
 0x197   : > { %2067 = vrsqrt.f32 %v851_v50  ;;  %v819_v41 = vmul.f32 0.0078125, %v735_v37  ;;  %v788_v14 = vmul.f32 0.0078125, %v673_v51  ;;  %v1045_v55 = vmul.f32 %v3093_v16, %v975_v53 }
 0x198   : > { %v2056_v2 = vpop.eup %2055  ;;  %2069 = vrsqrt.f32 %v882_v8  ;;  %v1190_v47 = vpack.c.bf16 %v1145_v49, %v1144_v11  ;;  %v1076_v46 = vmul.f32 %v3093_v16, %v1006_v57 }
 0x199   : > { %v2058_v48 = vpop.eup %2057  ;;  %v883_v54 = vadd.f32 1e-06, %v819_v41  ;;  %v852_v6 = vadd.f32 1e-06, %v788_v14  ;;  %v1115_v62 = vadd.f32 %v3100_v39, %v1045_v55  ;;  %v1007_v43 = vmul.f32 %v2056_v2, %v2844_v59 }
 0x19a   : > { %1910 = vmatprep.mubr.bf16.mxu1 %v1190_v47  ;;  %v675_v12 = vpop.xlane.xlu1 %674  ;;  %v737_v13 = vpop.xlane.xlu0 %736  ;;  %v976_v58 = vmul.f32 %v2058_v48, %v2851_v15  ;;  %v1146_v15 = vadd.f32 %v3100_v39, %v1076_v46 }
 0x19b   : > { %2071 = vrsqrt.f32 %v883_v54  ;;  %v789_v0 = vmul.f32 0.0078125, %v675_v12  ;;  %v820_v5 = vmul.f32 0.0078125, %v737_v13  ;;  %v1175_v45 = vpack.c.bf16 %v1115_v62, %v1114_v44 }
 0x19c   : > { %v2060_v7 = vpop.eup %2059  ;;  %2073 = vrsqrt.f32 %v852_v6  ;;  %v1077_v60 = vmul.f32 %v3093_v16, %v1007_v43  ;;  %v1046_v9 = vmul.f32 %v3093_v16, %v976_v58 }
 0x19d   : > { %v2062_v61 = vpop.eup %2061  ;;  %v853_v42 = vadd.f32 1e-06, %v789_v0  ;;  %v884_v59 = vadd.f32 1e-06, %v820_v5  ;;  %1879 = vmatmul.mubr.bf16.gmra.mxu0 %v1175_v45  ;;  %v977_v4 = vmul.f32 %v2060_v7, %v2854_v56 }
 0x19e   : > { %v739_v50 = vpop.xlane.xlu1 %738  ;;  %v677_v8 = vpop.xlane.xlu0 %676  ;;  %v1147_v53 = vadd.f32 %v3100_v39, %v1077_v60  ;;  %v1008_v37 = vmul.f32 %v2062_v61, %v2861_v17  ;;  %v1116_v14 = vadd.f32 %v3100_v39, %v1046_v9 }
 0x19f   : > { %2075 = vrsqrt.f32 %v853_v42  ;;  %v821_v51 = vmul.f32 0.0078125, %v739_v50  ;;  %v790_v11 = vmul.f32 0.0078125, %v677_v8  ;;  %v1047_v49 = vmul.f32 %v3093_v16, %v977_v4 }
 0x1a0   : > { %v2064_v57 = vpop.eup %2063  ;;  %2077 = vrsqrt.f32 %v884_v59  ;;  %v1191_v41 = vpack.c.bf16 %v1147_v53, %v1146_v15  ;;  %v1078_v54 = vmul.f32 %v3093_v16, %v1008_v37 }
 0x1a1   : > { %v2066_v55 = vpop.eup %2065  ;;  %v885_v56 = vadd.f32 1e-06, %v821_v51  ;;  %v854_v2 = vadd.f32 1e-06, %v790_v11  ;;  %v1117_v47 = vadd.f32 %v3100_v39, %v1047_v49  ;;  %v1009_v44 = vmul.f32 %v2064_v57, %v2864_v3 }
 0x1a2   : > { %1911 = vmatmul.mubr.bf16.gmra.mxu1 %v1191_v41  ;;  %v679_v48 = vpop.xlane.xlu1 %678  ;;  %v741_v17 = vpop.xlane.xlu0 %740  ;;  %v978_v6 = vmul.f32 %v2066_v55, %v2871_v19  ;;  %v1148_v19 = vadd.f32 %v3100_v39, %v1078_v54 }
 0x1a3   : > { %2079 = vrsqrt.f32 %v885_v56  ;;  %v791_v62 = vmul.f32 0.0078125, %v679_v48  ;;  %v822_v43 = vmul.f32 0.0078125, %v741_v17  ;;  %v1176_v12 = vpack.c.bf16 %v1117_v47, %v1116_v14 }
 0x1a4   : > { %v2068_v13 = vpop.eup %2067  ;;  %2081 = vrsqrt.f32 %v854_v2  ;;  %v1079_v46 = vmul.f32 %v3093_v16, %v1009_v44  ;;  %v1048_v58 = vmul.f32 %v3093_v16, %v978_v6 }
 0x1a5   : > { %v2070_v0 = vpop.eup %2069  ;;  %v855_v5 = vadd.f32 1e-06, %v791_v62  ;;  %v886_v3 = vadd.f32 1e-06, %v822_v43  ;;  %1882 = vmatprep.mubr.bf16.mxu0 %v1176_v12  ;;  %v979_v45 = vmul.f32 %v2068_v13, %v2874_v1 }
 0x1a6   : > { %v743_v7 = vpop.xlane.xlu1 %742  ;;  %v681_v60 = vpop.xlane.xlu0 %680  ;;  %v1149_v9 = vadd.f32 %v3100_v39, %v1079_v46  ;;  %v1010_v61 = vmul.f32 %v2070_v0, %v2881_v21  ;;  %v1118_v15 = vadd.f32 %v3100_v39, %v1048_v58 }
 0x1a7   : > { %2083 = vrsqrt.f32 %v855_v5  ;;  %v823_v42 = vmul.f32 0.0078125, %v743_v7  ;;  %v792_v59 = vmul.f32 0.0078125, %v681_v60  ;;  %v1049_v4 = vmul.f32 %v3093_v16, %v979_v45 }
 0x1a8   : > { %v2072_v50 = vpop.eup %2071  ;;  %2085 = vrsqrt.f32 %v886_v3  ;;  %v1192_v8 = vpack.c.bf16 %v1149_v9, %v1148_v19  ;;  %v1080_v57 = vmul.f32 %v3093_v16, %v1010_v61 }
 0x1a9   : > { %v2074_v53 = vpop.eup %2073  ;;  %v887_v1 = vadd.f32 1e-06, %v823_v42  ;;  %v856_v37 = vadd.f32 1e-06, %v792_v59  ;;  %v1119_v51 = vadd.f32 %v3100_v39, %v1049_v4  ;;  %v1011_v11 = vmul.f32 %v2072_v50, %v2884_v52 }
 0x1aa   : > { %1914 = vmatprep.mubr.bf16.mxu1 %v1192_v8  ;;  %v683_v49 = vpop.xlane.xlu1 %682  ;;  %v745_v21 = vpop.xlane.xlu0 %744  ;;  %v980_v41 = vmul.f32 %v2074_v53, %v2891_v23  ;;  %v1150_v23 = vadd.f32 %v3100_v39, %v1080_v57 }
 0x1ab   : > { %2087 = vrsqrt.f32 %v887_v1  ;;  %v793_v14 = vmul.f32 0.0078125, %v683_v49  ;;  %v824_v55 = vmul.f32 0.0078125, %v745_v21  ;;  %v1177_v56 = vpack.c.bf16 %v1119_v51, %v1118_v15 }
 0x1ac   : > { %v2076_v2 = vpop.eup %2075  ;;  %2089 = vrsqrt.f32 %v856_v37  ;;  %v1081_v47 = vmul.f32 %v3093_v16, %v1011_v11  ;;  %v1050_v44 = vmul.f32 %v3093_v16, %v980_v41 }
 0x1ad   : > { %v2078_v48 = vpop.eup %2077  ;;  %v857_v17 = vadd.f32 1e-06, %v793_v14  ;;  %v888_v52 = vadd.f32 1e-06, %v824_v55  ;;  %1883 = vmatmul.mubr.bf16.gmra.mxu0 %v1177_v56  ;;  %v981_v54 = vmul.f32 %v2076_v2, %v2894_v63 }
 0x1ae   : > { %v747_v6 = vpop.xlane.xlu1 %746  ;;  %v685_v62 = vpop.xlane.xlu0 %684  ;;  %v1151_v43 = vadd.f32 %v3100_v39, %v1081_v47  ;;  %v1012_v12 = vmul.f32 %v2078_v48, %v2901_v20  ;;  %v1120_v3 = vadd.f32 %v3100_v39, %v1050_v44 }
 0x1af   : > { %2091 = vrsqrt.f32 %v857_v17  ;;  %v825_v13 = vmul.f32 0.0078125, %v747_v6  ;;  %v794_v46 = vmul.f32 0.0078125, %v685_v62  ;;  %v1051_v58 = vmul.f32 %v3093_v16, %v981_v54 }
 0x1b0   : > { %v2080_v0 = vpop.eup %2079  ;;  %2093 = vrsqrt.f32 %v888_v52  ;;  %v1193_v5 = vpack.c.bf16 %v1151_v43, %v1150_v23  ;;  %v1082_v61 = vmul.f32 %v3093_v16, %v1012_v12 }
 0x1b1   : > { %v2082_v45 = vpop.eup %2081  ;;  %v889_v63 = vadd.f32 1e-06, %v825_v13  ;;  %v858_v7 = vadd.f32 1e-06, %v794_v46  ;;  %v1121_v60 = vadd.f32 %v3100_v39, %v1051_v58  ;;  %v1013_v19 = vmul.f32 %v2080_v0, %v2904_v25 }
 0x1b2   : > { %1915 = vmatmul.mubr.bf16.gmra.mxu1 %v1193_v5  ;;  %v687_v9 = vpop.xlane.xlu1 %686  ;;  %v749_v20 = vpop.xlane.xlu0 %748  ;;  %v982_v42 = vmul.f32 %v2082_v45, %v2911_v22  ;;  %v1152_v22 = vadd.f32 %v3100_v39, %v1082_v61 }
 0x1b3   : > { %2095 = vrsqrt.f32 %v889_v63  ;;  %v795_v59 = vmul.f32 0.0078125, %v687_v9  ;;  %v826_v4 = vmul.f32 0.0078125, %v749_v20  ;;  %v1178_v50 = vpack.c.bf16 %v1121_v60, %v1120_v3 }
 0x1b4   : > { %v2084_v8 = vpop.eup %2083  ;;  %2097 = vrsqrt.f32 %v858_v7  ;;  %v1083_v15 = vmul.f32 %v3093_v16, %v1013_v19  ;;  %v1052_v53 = vmul.f32 %v3093_v16, %v982_v42 }
 0x1b5   : > { %v2086_v1 = vpop.eup %2085  ;;  %v859_v37 = vadd.f32 1e-06, %v795_v59  ;;  %v890_v25 = vadd.f32 1e-06, %v826_v4  ;;  %1886 = vmatprep.mubr.bf16.mxu0 %v1178_v50  ;;  %v983_v51 = vmul.f32 %v2084_v8, %v2914_v26 }
 0x1b6   : > { %v751_v11 = vpop.xlane.xlu1 %750  ;;  %v689_v49 = vpop.xlane.xlu0 %688  ;;  %v1153_v21 = vadd.f32 %v3100_v39, %v1083_v15  ;;  %v1014_v57 = vmul.f32 %v2086_v1, %v2919_v10  ;;  %v1122_v47 = vadd.f32 %v3100_v39, %v1052_v53 }
 0x1b7   : > { %2099 = vrsqrt.f32 %v859_v37  ;;  %v827_v41 = vmul.f32 0.0078125, %v751_v11  ;;  %v796_v14 = vmul.f32 0.0078125, %v689_v49  ;;  %v1053_v55 = vmul.f32 %v3093_v16, %v983_v51 }
 0x1b8   : > { %v2088_v56 = vpop.eup %2087  ;;  %2101 = vrsqrt.f32 %v890_v25  ;;  %v1194_v2 = vpack.c.bf16 %v1153_v21, %v1152_v22  ;;  %v1084_v6 = vmul.f32 %v3093_v16, %v1014_v57 }
 0x1b9   : > { %v2090_v44 = vpop.eup %2089  ;;  %v891_v26 = vadd.f32 1e-06, %v827_v41  ;;  %v860_v48 = vadd.f32 1e-06, %v796_v14  ;;  %v1123_v17 = vadd.f32 %v3100_v39, %v1053_v55  ;;  %v1015_v52 = vmul.f32 %v2088_v56, %v2922_v24 }
 0x1ba   : > { %1918 = vmatprep.mubr.bf16.mxu1 %v1194_v2  ;;  %v691_v54 = vpop.xlane.xlu1 %690  ;;  %v753_v10 = vpop.xlane.xlu0 %752  ;;  %v984_v62 = vmul.f32 %v2090_v44, %v2929_v27  ;;  %v1154_v27 = vadd.f32 %v3100_v39, %v1084_v6 }
 0x1bb   : > { %2103 = vrsqrt.f32 %v891_v26  ;;  %v797_v23 = vmul.f32 0.0078125, %v691_v54  ;;  %v828_v43 = vmul.f32 0.0078125, %v753_v10  ;;  %v1179_v12 = vpack.c.bf16 %v1123_v17, %v1122_v47 }
 0x1bc   : > { %v2092_v13 = vpop.eup %2091  ;;  %2105 = vrsqrt.f32 %v860_v48  ;;  %v1085_v46 = vmul.f32 %v3093_v16, %v1015_v52  ;;  %v1054_v58 = vmul.f32 %v3093_v16, %v984_v62 }
 0x1bd   : > { %v2094_v0 = vpop.eup %2093  ;;  %v861_v5 = vadd.f32 1e-06, %v797_v23  ;;  %v892_v24 = vadd.f32 1e-06, %v828_v43  ;;  %1887 = vmatmul.mubr.bf16.gmra.mxu0 %v1179_v12  ;;  %v985_v3 = vmul.f32 %v2092_v13, %v2932_v30 }
 0x1be   : > { %v755_v45 = vpop.xlane.xlu1 %754  ;;  %v693_v63 = vpop.xlane.xlu0 %692  ;;  %v1155_v7 = vadd.f32 %v3100_v39, %v1085_v46  ;;  %v1016_v60 = vmul.f32 %v2094_v0, %v2939_v29  ;;  %v1124_v59 = vadd.f32 %v3100_v39, %v1054_v58 }
 0x1bf   : > { %2107 = vrsqrt.f32 %v861_v5  ;;  %v829_v19 = vmul.f32 0.0078125, %v755_v45  ;;  %v798_v9 = vmul.f32 0.0078125, %v693_v63  ;;  %v1055_v20 = vmul.f32 %v3093_v16, %v985_v3 }
 0x1c0   : > { %v2096_v61 = vpop.eup %2095  ;;  %2109 = vrsqrt.f32 %v892_v24  ;;  %v1195_v42 = vpack.c.bf16 %v1155_v7, %v1154_v27  ;;  %v1086_v1 = vmul.f32 %v3093_v16, %v1016_v60 }
 0x1c1   : > { %v2098_v4 = vpop.eup %2097  ;;  %v893_v30 = vadd.f32 1e-06, %v829_v19  ;;  %v862_v50 = vadd.f32 1e-06, %v798_v9  ;;  %v1125_v8 = vadd.f32 %v3100_v39, %v1055_v20  ;;  %v1017_v15 = vmul.f32 %v2096_v61, %v2942_v32 }
 0x1c2   : > { %1919 = vmatmul.mubr.bf16.gmra.mxu1 %v1195_v42  ;;  %v695_v53 = vpop.xlane.xlu1 %694  ;;  %v757_v29 = vpop.xlane.xlu0 %756  ;;  %v986_v37 = vmul.f32 %v2098_v4, %v2949_v18  ;;  %v1156_v18 = vadd.f32 %v3100_v39, %v1086_v1 }
 0x1c3   : > { %2111 = vrsqrt.f32 %v893_v30  ;;  %v799_v25 = vmul.f32 0.0078125, %v695_v53  ;;  %v830_v51 = vmul.f32 0.0078125, %v757_v29  ;;  %v1180_v11 = vpack.c.bf16 %v1125_v8, %v1124_v59 }
 0x1c4   : > { %v2100_v49 = vpop.eup %2099  ;;  %2113 = vrsqrt.f32 %v862_v50  ;;  %v1087_v22 = vmul.f32 %v3093_v16, %v1017_v15  ;;  %v1056_v21 = vmul.f32 %v3093_v16, %v986_v37 }
 0x1c5   : > { %v2102_v57 = vpop.eup %2101  ;;  %v863_v41 = vadd.f32 1e-06, %v799_v25  ;;  %v894_v32 = vadd.f32 1e-06, %v830_v51  ;;  %1890 = vmatprep.mubr.bf16.mxu0 %v1180_v11  ;;  %v987_v14 = vmul.f32 %v2100_v49, %v2952_v34 }
 0x1c6   : > { %v759_v55 = vpop.xlane.xlu1 %758  ;;  %v697_v56 = vpop.xlane.xlu0 %696  ;;  %v1157_v2 = vadd.f32 %v3100_v39, %v1087_v22  ;;  %v1018_v47 = vmul.f32 %v2102_v57, %v2959_v28  ;;  %v1126_v54 = vadd.f32 %v3100_v39, %v1056_v21 }
 0x1c7   : > { %2115 = vrsqrt.f32 %v863_v41  ;;  %v831_v44 = vmul.f32 0.0078125, %v759_v55  ;;  %v800_v26 = vmul.f32 0.0078125, %v697_v56  ;;  %v1057_v48 = vmul.f32 %v3093_v16, %v987_v14 }
 0x1c8   : > { %v2104_v17 = vpop.eup %2103  ;;  %2117 = vrsqrt.f32 %v894_v32  ;;  %v1196_v52 = vpack.c.bf16 %v1157_v2, %v1156_v18  ;;  %v1088_v12 = vmul.f32 %v3093_v16, %v1018_v47  ;;  %v3640_v32 = vld [vmem:[#allocation25_spill] sm:$0xff]  ;;  %v3641_v2 = vld [vmem:[#allocation26_spill] sm:$0xff] }
 0x1c9   : > { %v2106_v10 = vpop.eup %2105  ;;  %v895_v34 = vadd.f32 1e-06, %v831_v44  ;;  %v864_v6 = vadd.f32 1e-06, %v800_v26  ;;  %v1127_v62 = vadd.f32 %v3100_v39, %v1057_v48  ;;  %v1019_v23 = vmul.f32 %v2104_v17, %v2962_v36 }
 0x1ca   : > { %1922 = vmatprep.mubr.bf16.mxu1 %v1196_v52  ;;  %v699_v43 = vpop.xlane.xlu1 %698  ;;  %v761_v28 = vpop.xlane.xlu0 %760  ;;  %v988_v13 = vmul.f32 %v2106_v10, %v2969_v31  ;;  %v1158_v31 = vadd.f32 %v3100_v39, %v1088_v12 }
 0x1cb   : > { %2119 = vrsqrt.f32 %v895_v34  ;;  %v801_v46 = vmul.f32 0.0078125, %v699_v43  ;;  %v832_v58 = vmul.f32 0.0078125, %v761_v28  ;;  %v1181_v0 = vpack.c.bf16 %v1127_v62, %v1126_v54 }
 0x1cc   : > { %v2108_v5 = vpop.eup %2107  ;;  %2121 = vrsqrt.f32 %v864_v6  ;;  %v1089_v24 = vmul.f32 %v3093_v16, %v1019_v23  ;;  %v1058_v3 = vmul.f32 %v3093_v16, %v988_v13  ;;  %v3642_v23 = vld [vmem:[#allocation27_spill] sm:$0xff] }
 0x1cd   : > { %v2110_v45 = vpop.eup %2109  ;;  %v865_v63 = vadd.f32 1e-06, %v801_v46  ;;  %v896_v36 = vadd.f32 1e-06, %v832_v58  ;;  %1891 = vmatmul.mubr.bf16.gmra.mxu0 %v1181_v0  ;;  %v989_v27 = vmul.f32 %v2108_v5, %v2972_v38  ;;  %v3643_v46 = vld [vmem:[#allocation28_spill] sm:$0xff] }
 0x1ce   : > { %v763_v7 = vpop.xlane.xlu1 %762  ;;  %v701_v60 = vpop.xlane.xlu0 %700  ;;  %v1159_v19 = vadd.f32 %v3100_v39, %v1089_v24  ;;  %v1020_v9 = vmul.f32 %v2110_v45, %v2979_v33  ;;  %v1128_v30 = vadd.f32 %v3100_v39, %v1058_v3 }
 0x1cf   : > { %2123 = vrsqrt.f32 %v865_v63  ;;  %v833_v20 = vmul.f32 0.0078125, %v763_v7  ;;  %v802_v61 = vmul.f32 0.0078125, %v701_v60  ;;  %v1059_v42 = vmul.f32 %v3093_v16, %v989_v27  ;;  %v3644_v60 = vld [vmem:[#allocation29_spill] sm:$0xff] }
 0x1d0   : > { %v2112_v59 = vpop.eup %2111  ;;  %2125 = vrsqrt.f32 %v896_v36  ;;  %v1197_v4 = vpack.c.bf16 %v1159_v19, %v1158_v31  ;;  %v1090_v1 = vmul.f32 %v3093_v16, %v1020_v9 }
 0x1d1   : > { %v2114_v50 = vpop.eup %2113  ;;  %v897_v38 = vadd.f32 1e-06, %v833_v20  ;;  %v866_v8 = vadd.f32 1e-06, %v802_v61  ;;  %v1129_v15 = vadd.f32 %v3100_v39, %v1059_v42  ;;  %v1021_v53 = vmul.f32 %v2112_v59, %v2982_v40  ;;  %v3645_v42 = vld [vmem:[#allocation30_spill] sm:$0xff] }
 0x1d2   : > { %1923 = vmatmul.mubr.bf16.gmra.mxu1 %v1197_v4  ;;  %v703_v29 = vpop.xlane.xlu1 %702  ;;  %v765_v33 = vpop.xlane.xlu0 %764  ;;  %v990_v37 = vmul.f32 %v2114_v50, %v2989_v35  ;;  %v1160_v35 = vadd.f32 %v3100_v39, %v1090_v1 }
 0x1d3   : > { %2127 = vrsqrt.f32 %v897_v38  ;;  %v803_v25 = vmul.f32 0.0078125, %v703_v29  ;;  %v834_v51 = vmul.f32 0.0078125, %v765_v33  ;;  %v1182_v11 = vpack.c.bf16 %v1129_v15, %v1128_v30 }
 0x1d4   : > { %v2116_v49 = vpop.eup %2115  ;;  %2129 = vrsqrt.f32 %v866_v8  ;;  %v1091_v22 = vmul.f32 %v3093_v16, %v1021_v53  ;;  %v1060_v21 = vmul.f32 %v3093_v16, %v990_v37  ;;  %v3646_v37 = vld [vmem:[#allocation11_spill] sm:$0xff] }
 0x1d5   : > { %v2118_v57 = vpop.eup %2117  ;;  %v867_v41 = vadd.f32 1e-06, %v803_v25  ;;  %v898_v40 = vadd.f32 1e-06, %v834_v51  ;;  %1894 = vmatprep.mubr.bf16.mxu0 %v1182_v11  ;;  %v991_v14 = vmul.f32 %v2116_v49, %v3640_v32 }
 0x1d6   : > { %v767_v55 = vpop.xlane.xlu1 %766  ;;  %v705_v56 = vpop.xlane.xlu0 %704  ;;  %v1161_v18 = vadd.f32 %v3100_v39, %v1091_v22  ;;  %v1022_v47 = vmul.f32 %v2118_v57, %v3641_v2  ;;  %v1130_v54 = vadd.f32 %v3100_v39, %v1060_v21  ;;  %v3647_v22 = vld [vmem:[#allocation12_spill] sm:$0xff]  ;;  %v3648_v2 = vld [vmem:[#allocation13_spill] sm:$0xff] }
 0x1d7   : > { %2131 = vrsqrt.f32 %v867_v41  ;;  %v835_v44 = vmul.f32 0.0078125, %v767_v55  ;;  %v804_v26 = vmul.f32 0.0078125, %v705_v56  ;;  %v1061_v48 = vmul.f32 %v3093_v16, %v991_v14 }
 0x1d8   : > { %v2120_v17 = vpop.eup %2119  ;;  %2133 = vrsqrt.f32 %v898_v40  ;;  %v1198_v52 = vpack.c.bf16 %v1161_v18, %v1160_v35  ;;  %v1092_v13 = vmul.f32 %v3093_v16, %v1022_v47 }
 0x1d9   : > { %v2122_v10 = vpop.eup %2121  ;;  %v899_v34 = vadd.f32 1e-06, %v835_v44  ;;  %v868_v6 = vadd.f32 1e-06, %v804_v26  ;;  %v1131_v62 = vadd.f32 %v3100_v39, %v1061_v48  ;;  %v1023_v43 = vmul.f32 %v2120_v17, %v3642_v23  ;;  %v3649_v17 = vld [vmem:[#allocation14_spill] sm:$0xff] }
 0x1da   : > { %1926 = vmatprep.mubr.bf16.mxu1 %v1198_v52  ;;  %v707_v28 = vpop.xlane.xlu1 %706  ;;  %v769_v12 = vpop.xlane.xlu0 %768  ;;  %v992_v58 = vmul.f32 %v2122_v10, %v3643_v46  ;;  %v1162_v20 = vadd.f32 %v3100_v39, %v1092_v13 }
 0x1db   : > { %2135 = vrsqrt.f32 %v899_v34  ;;  %v805_v0 = vmul.f32 0.0078125, %v707_v28  ;;  %v836_v5 = vmul.f32 0.0078125, %v769_v12  ;;  %v1183_v24 = vpack.c.bf16 %v1131_v62, %v1130_v54  ;;  %v3650_v12 = vld [vmem:[#allocation15_spill] sm:$0xff] }
 0x1dc   : > { %v2124_v3 = vpop.eup %2123  ;;  %2137 = vrsqrt.f32 %v868_v6  ;;  %v1093_v45 = vmul.f32 %v3093_v16, %v1023_v43  ;;  %v1062_v63 = vmul.f32 %v3093_v16, %v992_v58  ;;  %v3651_v58 = vld [vmem:[#allocation16_spill] sm:$0xff] }
 0x1dd   : > { %v2126_v36 = vpop.eup %2125  ;;  %v869_v27 = vadd.f32 1e-06, %v805_v0  ;;  %v900_v7 = vadd.f32 1e-06, %v836_v5  ;;  %1895 = vmatmul.mubr.bf16.gmra.mxu0 %v1183_v24  ;;  %v993_v31 = vmul.f32 %v2124_v3, %v3644_v60 }
 0x1de   : > { %v771_v19 = vpop.xlane.xlu1 %770  ;;  %v709_v9 = vpop.xlane.xlu0 %708  ;;  %v1163_v61 = vadd.f32 %v3100_v39, %v1093_v45  ;;  %v1024_v59 = vmul.f32 %v2126_v36, %v3645_v42  ;;  %v1132_v15 = vadd.f32 %v3100_v39, %v1062_v63 }
 0x1df   : > { %2139 = vrsqrt.f32 %v869_v27  ;;  %v837_v4 = vmul.f32 0.0078125, %v771_v19  ;;  %v806_v30 = vmul.f32 0.0078125, %v709_v9  ;;  %v1063_v50 = vmul.f32 %v3093_v16, %v993_v31  ;;  %v3652_v27 = vld [vmem:[#allocation17_spill] sm:$0xff]  ;;  %v3653_v31 = vld [vmem:[#allocation18_spill] sm:$0xff] }
 0x1e0   : > { %v2128_v38 = vpop.eup %2127  ;;  %2141 = vrsqrt.f32 %v900_v7  ;;  %v1199_v8 = vpack.c.bf16 %v1163_v61, %v1162_v20  ;;  %v1094_v49 = vmul.f32 %v3093_v16, %v1024_v59 }
 0x1e1   : > { %v2130_v53 = vpop.eup %2129  ;;  %v901_v29 = vadd.f32 1e-06, %v837_v4  ;;  %v870_v33 = vadd.f32 1e-06, %v806_v30  ;;  %v1133_v1 = vadd.f32 %v3100_v39, %v1063_v50  ;;  %v1025_v25 = vmul.f32 %v2128_v38, %v3646_v37  ;;  %v3654_v30 = vld [vmem:[#allocation19_spill] sm:$0xff] }
 0x1e2   : > { %1927 = vmatmul.mubr.bf16.gmra.mxu1 %v1199_v8  ;;  %v711_v51 = vpop.xlane.xlu1 %710  ;;  %v773_v11 = vpop.xlane.xlu0 %772  ;;  %v994_v21 = vmul.f32 %v2130_v53, %v3647_v22  ;;  %v1164_v26 = vadd.f32 %v3100_v39, %v1094_v49  ;;  %v2153_v38 = vld [vmem:[%s3540_s1] ss:$0 sm:$0xff] }
 0x1e3   : > { %2143 = vrsqrt.f32 %v901_v29  ;;  %v807_v57 = vmul.f32 0.0078125, %v711_v51  ;;  %v838_v41 = vmul.f32 0.0078125, %v773_v11  ;;  %v1184_v40 = vpack.c.bf16 %v1133_v1, %v1132_v15  ;;  %v3655_v15 = vld [vmem:[#allocation20_spill] sm:$0xff]  ;;  %v3656_v51 = vld [vmem:[#allocation21_spill] sm:$0xff]  ;;  %v3657_v22 = vld [vmem:[#allocation31_spill] sm:$0xff] }
 0x1e4   : > { %v2132_v32 = vpop.eup %2131  ;;  %2145 = vrsqrt.f32 %v870_v33  ;;  %v1095_v14 = vmul.f32 %v3093_v16, %v1025_v25  ;;  %v1064_v55 = vmul.f32 %v3093_v16, %v994_v21 }
 0x1e5   : > { %v2134_v56 = vpop.eup %2133  ;;  %v871_v35 = vadd.f32 1e-06, %v807_v57  ;;  %v902_v18 = vadd.f32 1e-06, %v838_v41  ;;  %1898 = vmatprep.mubr.bf16.mxu0 %v1184_v40  ;;  %v995_v47 = vmul.f32 %v2132_v32, %v3648_v2  ;;  %v2154_v32 = vld [vmem:[%s3541_s2] ss:$0 sm:$0xff] }
 0x1e6   : > { %v775_v44 = vpop.xlane.xlu1 %774  ;;  %v1165_v48 = vadd.f32 %v3100_v39, %v1095_v14  ;;  %v1026_v52 = vmul.f32 %v2134_v56, %v3649_v17  ;;  %v1134_v62 = vadd.f32 %v3100_v39, %v1064_v55  ;;  %v3658_v56 = vld [vmem:[#allocation22_spill] sm:$0xff] }
 0x1e7   : > { %2147 = vrsqrt.f32 %v871_v35  ;;  %v839_v54 = vmul.f32 0.0078125, %v775_v44  ;;  %v1065_v10 = vmul.f32 %v3093_v16, %v995_v47 }
 0x1e8   : > { %v2136_v34 = vpop.eup %2135  ;;  %2149 = vrsqrt.f32 %v902_v18  ;;  %v1200_v6 = vpack.c.bf16 %v1165_v48, %v1164_v26  ;;  %v1096_v46 = vmul.f32 %v3093_v16, %v1026_v52  ;;  %v3291_v48 = vld [vmem:[%s3543_s4] ss:$0 sm:$0xff] }
 0x1e9   : > { %v2138_v23 = vpop.eup %2137  ;;  %v903_v43 = vadd.f32 1e-06, %v839_v54  ;;  %v1135_v28 = vadd.f32 %v3100_v39, %v1065_v10  ;;  %v1027_v13 = vmul.f32 %v2136_v34, %v3650_v12  ;;  %v2155_v10 = vld [vmem:[%s2504_s17 + $0x10] sm:$0xff] }
 0x1ea   : > { %1930 = vmatprep.mubr.bf16.mxu1 %v1200_v6  ;;  %v996_v0 = vmul.f32 %v2138_v23, %v3651_v58  ;;  %v1166_v63 = vadd.f32 %v3100_v39, %v1096_v46  ;;  %v2156_v23 = vld [vmem:[%s2504_s17] sm:$0xff]  ;;  %v2157_v58 = vld [vmem:[%s2504_s17 + $0x18] sm:$0xff] }
 0x1eb   : > { %2151 = vrsqrt.f32 %v903_v43  ;;  %v1185_v5 = vpack.c.bf16 %v1135_v28, %v1134_v62  ;;  %v1097_v24 = vmul.f32 %v3093_v16, %v1027_v13 }
 0x1ec   : > { %v2140_v3 = vpop.eup %2139  ;;  %v1066_v60 = vmul.f32 %v3093_v16, %v996_v0 }
 0x1ed   : > { %v2142_v45 = vpop.eup %2141  ;;  %1899 = vmatmul.mubr.bf16.gmra.mxu0 %v1185_v5  ;;  %v1167_v36 = vadd.f32 %v3100_v39, %v1097_v24  ;;  %v997_v7 = vmul.f32 %v2140_v3, %v3652_v27  ;;  %v2158_v3 = vld [vmem:[%s2504_s17 + $0x110] sm:$0xff] }
 0x1ee   : > { %v1028_v19 = vmul.f32 %v2142_v45, %v3653_v31  ;;  %v1136_v59 = vadd.f32 %v3100_v39, %v1066_v60  ;;  %v2160_v60 = vld [vmem:[%s2504_s17 + $0x100] sm:$0xff] }
 0x1ef   : > { %v1201_v9 = vpack.c.bf16 %v1167_v36, %v1166_v63  ;;  %v1067_v20 = vmul.f32 %v3093_v16, %v997_v7  ;;  %v2159_v36 = vld [vmem:[%s2504_s17 + $0x8] sm:$0xff] }
 0x1f0   : > { %v2144_v61 = vpop.eup %2143  ;;  %v1098_v8 = vmul.f32 %v2153_v38, %v1028_v19 }
 0x1f1   : > { %v2146_v42 = vpop.eup %2145  ;;  %1931 = vmatmul.mubr.bf16.gmra.mxu1 %v1201_v9  ;;  %v1137_v4 = vadd.f32 %v3100_v39, %v1067_v20  ;;  %v1029_v50 = vmul.f32 %v2144_v61, %v3654_v30  ;;  %v2161_v20 = vld [vmem:[%s2504_s17 + $0x118] sm:$0xff] }
 0x1f2   : > { %v998_v53 = vmul.f32 %v2146_v42, %v3655_v15  ;;  %v1168_v37 = vadd.f32 %v3100_v39, %v1098_v8  ;;  %v2163_v8 = vld [vmem:[%s2504_s17 + $0x30] sm:$0xff] }
 0x1f3   : > { %v1186_v29 = vpack.c.bf16 %v1137_v4, %v1136_v59  ;;  %v1099_v33 = vmul.f32 %v2153_v38, %v1029_v50  ;;  %v2162_v59 = vld [vmem:[%s2504_s17 + $0x108] sm:$0xff] }
 0x1f4   : > { %v2148_v1 = vpop.eup %2147  ;;  %v1068_v49 = vmul.f32 %v2153_v38, %v998_v53 }
 0x1f5   : > { %v2150_v16 = vpop.eup %2149  ;;  %1902 = vmatprep.mubr.bf16.mxu0 %v1186_v29  ;;  %v1169_v25 = vadd.f32 %v3100_v39, %v1099_v33  ;;  %v999_v11 = vmul.f32 %v2148_v1, %v3656_v51  ;;  %v2164_v33 = vld [vmem:[%s2504_s17 + $0x20] sm:$0xff] }
 0x1f6   : > { %v1030_v21 = vmul.f32 %v2150_v16, %v3657_v22  ;;  %v1138_v14 = vadd.f32 %v2154_v32, %v1068_v49 }
 0x1f7   : > { %v1202_v57 = vpack.c.bf16 %v1169_v25, %v1168_v37  ;;  %v1069_v41 = vmul.f32 %v2153_v38, %v999_v11  ;;  %v2165_v11 = vld [vmem:[%s2504_s17 + $0x38] sm:$0xff] }
 0x1f8   : > { %v2152_v40 = vpop.eup %2151  ;;  %v1100_v18 = vmul.f32 %v2153_v38, %v1030_v21 }
 0x1f9   : > { %1934 = vmatprep.mubr.bf16.mxu1 %v1202_v57  ;;  %v1139_v55 = vadd.f32 %v2154_v32, %v1069_v41  ;;  %v1031_v35 = vmul.f32 %v2152_v40, %v3658_v56  ;;  %v2166_v57 = vld [vmem:[%s2504_s17 + $0x130] sm:$0xff]  ;;  %v2168_v56 = vld [vmem:[%s2504_s17 + $0x120] sm:$0xff] }
 0x1fa   : > { %v1170_v47 = vadd.f32 %v2154_v32, %v1100_v18 }
 0x1fb   : > { %v1187_v39 = vpack.c.bf16 %v1139_v55, %v1138_v14  ;;  %v1101_v2 = vmul.f32 %v2153_v38, %v1031_v35 }
 0x1fd   : > { %1903 = vmatmul.mubr.bf16.gmra.mxu0 %v1187_v39  ;;  %v1171_v44 = vadd.f32 %v2154_v32, %v1101_v2  ;;  %v2167_v32 = vld [vmem:[%s2504_s17 + $0x28] sm:$0xff]  ;;  %v2169_v2 = vld [vmem:[%s2504_s17 + $0x138] sm:$0xff] }
 0x1ff   : > { %v1203_v26 = vpack.c.bf16 %v1171_v44, %v1170_v47 }
 0x201   : > { %1935 = vmatmul.mubr.bf16.gmra.mxu1 %v1203_v26  ;;  %v2170_v26 = vld [vmem:[%s2504_s17 + $0x128] sm:$0xff] }
 0x24d   : > { %v1876_v17 = vpop.f32.mrf.mxu0 }
 0x24e   : > { %v1318_v52 = vadd.f32 %v1876_v17, %v3291_v48 }
 0x24f   : > { %v1309_v54 = vpop.f32.mrf.mxu0 }
 0x250   : > { %v1566_v34 = vadd.f32 %v2155_v10, %v1318_v52  ;;  %v1310_v6 = vadd.f32 %v3291_v48, %v1309_v54 }
 0x251   : > { %v1877_v62 = vpop.f32.mrf.mxu0 }
 0x252   : > { %1630 = vst [vmem:[%s3298_s9 + $0x10] sm:$0xff] %v1566_v34  ;;  %v1564_v43 = vadd.f32 %v2156_v23, %v1310_v6  ;;  %v1321_v28 = vadd.f32 %v1877_v62, %v3291_v48  ;;  %v1908_v12 = vpop.f32.mrf.mxu1  ;;  %v2171_v34 = vld [vmem:[%s2504_s17 + $0x50] sm:$0xff] }
 0x253   : > { %v1446_v13 = vadd.f32 %v1908_v12, %v3291_v48  ;;  %v1312_v46 = vpop.f32.mrf.mxu0 }
 0x254   : > { %1628 = vst [vmem:[%s3298_s9] sm:$0xff] %v1564_v43  ;;  %v1567_v0 = vadd.f32 %v2157_v58, %v1321_v28  ;;  %v1313_v5 = vadd.f32 %v3291_v48, %v1312_v46  ;;  %v1437_v24 = vpop.f32.mrf.mxu1  ;;  %v2172_v43 = vld [vmem:[%s2504_s17 + $0x40] sm:$0xff] }
 0x255   : > { %v1598_v45 = vadd.f32 %v2158_v3, %v1446_v13  ;;  %v1438_v63 = vadd.f32 %v3291_v48, %v1437_v24 }
 0x256   : > { %1631 = vst [vmem:[%s3298_s9 + $0x18] sm:$0xff] %v1567_v0  ;;  %v1565_v27 = vadd.f32 %v2159_v36, %v1313_v5  ;;  %v1909_v7 = vpop.f32.mrf.mxu1  ;;  %v2173_v0 = vld [vmem:[%s2504_s17 + $0x58] sm:$0xff] }
 0x257   : > { %1662 = vst [vmem:[%s3298_s9 + $0x110] sm:$0xff] %v1598_v45  ;;  %v1596_v31 = vadd.f32 %v2160_v60, %v1438_v63  ;;  %v1449_v19 = vadd.f32 %v1909_v7, %v3291_v48  ;;  %v2174_v45 = vld [vmem:[%s2504_s17 + $0x150] sm:$0xff] }
 0x258   : > { %1629 = vst [vmem:[%s3298_s9 + $0x8] sm:$0xff] %v1565_v27  ;;  %v1440_v9 = vpop.f32.mrf.mxu1  ;;  %v2175_v27 = vld [vmem:[%s2504_s17 + $0x48] sm:$0xff] }
 0x259   : > { %1660 = vst [vmem:[%s3298_s9 + $0x100] sm:$0xff] %v1596_v31  ;;  %v1599_v61 = vadd.f32 %v2161_v20, %v1449_v19  ;;  %v1441_v42 = vadd.f32 %v3291_v48, %v1440_v9  ;;  %v2176_v31 = vld [vmem:[%s2504_s17 + $0x140] sm:$0xff] }
 0x25b   : > { %1663 = vst [vmem:[%s3298_s9 + $0x118] sm:$0xff] %v1599_v61  ;;  %v1597_v4 = vadd.f32 %v2162_v59, %v1441_v42  ;;  %v2177_v61 = vld [vmem:[%s2504_s17 + $0x158] sm:$0xff] }
 0x25d   : > { %1661 = vst [vmem:[%s3298_s9 + $0x108] sm:$0xff] %v1597_v4  ;;  %v1880_v30 = vpop.f32.mrf.mxu0  ;;  %v2178_v4 = vld [vmem:[%s2504_s17 + $0x148] sm:$0xff] }
 0x25e   : > { %v1334_v50 = vadd.f32 %v1880_v30, %v3291_v48 }
 0x25f   : > { %v1325_v38 = vpop.f32.mrf.mxu0 }
 0x260   : > { %v1570_v15 = vadd.f32 %v2163_v8, %v1334_v50  ;;  %v1326_v53 = vadd.f32 %v3291_v48, %v1325_v38 }
 0x261   : > { %v1881_v29 = vpop.f32.mrf.mxu0 }
 0x262   : > { %1634 = vst [vmem:[%s3298_s9 + $0x30] sm:$0xff] %v1570_v15  ;;  %v1568_v1 = vadd.f32 %v2164_v33, %v1326_v53  ;;  %v1337_v16 = vadd.f32 %v1881_v29, %v3291_v48  ;;  %v1912_v37 = vpop.f32.mrf.mxu1  ;;  %v2179_v15 = vld [vmem:[%s2504_s17 + $0x70] sm:$0xff] }
 0x263   : > { %v1462_v25 = vadd.f32 %v1912_v37, %v3291_v48  ;;  %v1328_v51 = vpop.f32.mrf.mxu0 }
 0x264   : > { %1632 = vst [vmem:[%s3298_s9 + $0x20] sm:$0xff] %v1568_v1  ;;  %v1571_v49 = vadd.f32 %v2165_v11, %v1337_v16  ;;  %v1329_v22 = vadd.f32 %v3291_v48, %v1328_v51  ;;  %v1453_v21 = vpop.f32.mrf.mxu1  ;;  %v2180_v1 = vld [vmem:[%s2504_s17 + $0x60] sm:$0xff] }
 0x265   : > { %v1602_v41 = vadd.f32 %v2166_v57, %v1462_v25  ;;  %v1454_v40 = vadd.f32 %v3291_v48, %v1453_v21 }
 0x266   : > { %1635 = vst [vmem:[%s3298_s9 + $0x38] sm:$0xff] %v1571_v49  ;;  %v1569_v14 = vadd.f32 %v2167_v32, %v1329_v22  ;;  %v1913_v55 = vpop.f32.mrf.mxu1  ;;  %v2181_v49 = vld [vmem:[%s2504_s17 + $0x78] sm:$0xff] }
 0x267   : > { %1666 = vst [vmem:[%s3298_s9 + $0x130] sm:$0xff] %v1602_v41  ;;  %v1600_v35 = vadd.f32 %v2168_v56, %v1454_v40  ;;  %v1465_v18 = vadd.f32 %v1913_v55, %v3291_v48  ;;  %v2182_v41 = vld [vmem:[%s2504_s17 + $0x170] sm:$0xff] }
 0x268   : > { %1633 = vst [vmem:[%s3298_s9 + $0x28] sm:$0xff] %v1569_v14  ;;  %v1456_v39 = vpop.f32.mrf.mxu1  ;;  %v2183_v14 = vld [vmem:[%s2504_s17 + $0x68] sm:$0xff] }
 0x269   : > { %1664 = vst [vmem:[%s3298_s9 + $0x120] sm:$0xff] %v1600_v35  ;;  %v1603_v47 = vadd.f32 %v2169_v2, %v1465_v18  ;;  %v1457_v44 = vadd.f32 %v3291_v48, %v1456_v39  ;;  %v2184_v35 = vld [vmem:[%s2504_s17 + $0x160] sm:$0xff] }
 0x26b   : > { %1667 = vst [vmem:[%s3298_s9 + $0x138] sm:$0xff] %v1603_v47  ;;  %v1601_v17 = vadd.f32 %v2170_v26, %v1457_v44  ;;  %v2185_v47 = vld [vmem:[%s2504_s17 + $0x178] sm:$0xff] }
 0x26d   : > { %1665 = vst [vmem:[%s3298_s9 + $0x128] sm:$0xff] %v1601_v17  ;;  %v1884_v52 = vpop.f32.mrf.mxu0  ;;  %v2186_v17 = vld [vmem:[%s2504_s17 + $0x168] sm:$0xff] }
 0x26e   : > { %v1350_v54 = vadd.f32 %v1884_v52, %v3291_v48 }
 0x26f   : > { %v1341_v10 = vpop.f32.mrf.mxu0 }
 0x270   : > { %v1574_v6 = vadd.f32 %v2171_v34, %v1350_v54  ;;  %v1342_v62 = vadd.f32 %v3291_v48, %v1341_v10 }
 0x271   : > { %v1885_v23 = vpop.f32.mrf.mxu0 }
 0x272   : > { %1638 = vst [vmem:[%s3298_s9 + $0x50] sm:$0xff] %v1574_v6  ;;  %v1572_v28 = vadd.f32 %v2172_v43, %v1342_v62  ;;  %v1353_v12 = vadd.f32 %v1885_v23, %v3291_v48  ;;  %v1916_v13 = vpop.f32.mrf.mxu1  ;;  %v2187_v6 = vld [vmem:[%s2504_s17 + $0x90] sm:$0xff] }
 0x273   : > { %v1478_v46 = vadd.f32 %v1916_v13, %v3291_v48  ;;  %v1344_v58 = vpop.f32.mrf.mxu0 }
 0x274   : > { %1636 = vst [vmem:[%s3298_s9 + $0x40] sm:$0xff] %v1572_v28  ;;  %v1575_v5 = vadd.f32 %v2173_v0, %v1353_v12  ;;  %v1345_v24 = vadd.f32 %v3291_v48, %v1344_v58  ;;  %v1469_v3 = vpop.f32.mrf.mxu1  ;;  %v2188_v28 = vld [vmem:[%s2504_s17 + $0x80] sm:$0xff] }
 0x275   : > { %v1606_v63 = vadd.f32 %v2174_v45, %v1478_v46  ;;  %v1470_v36 = vadd.f32 %v3291_v48, %v1469_v3 }
 0x276   : > { %1639 = vst [vmem:[%s3298_s9 + $0x58] sm:$0xff] %v1575_v5  ;;  %v1573_v7 = vadd.f32 %v2175_v27, %v1345_v24  ;;  %v1917_v60 = vpop.f32.mrf.mxu1  ;;  %v2189_v5 = vld [vmem:[%s2504_s17 + $0x98] sm:$0xff] }
 0x277   : > { %1670 = vst [vmem:[%s3298_s9 + $0x150] sm:$0xff] %v1606_v63  ;;  %v1604_v19 = vadd.f32 %v2176_v31, %v1470_v36  ;;  %v1481_v9 = vadd.f32 %v1917_v60, %v3291_v48  ;;  %v2190_v63 = vld [vmem:[%s2504_s17 + $0x190] sm:$0xff] }
 0x278   : > { %1637 = vst [vmem:[%s3298_s9 + $0x48] sm:$0xff] %v1573_v7  ;;  %v1472_v20 = vpop.f32.mrf.mxu1  ;;  %v2191_v7 = vld [vmem:[%s2504_s17 + $0x88] sm:$0xff] }
 0x279   : > { %1668 = vst [vmem:[%s3298_s9 + $0x140] sm:$0xff] %v1604_v19  ;;  %v1607_v42 = vadd.f32 %v2177_v61, %v1481_v9  ;;  %v1473_v59 = vadd.f32 %v3291_v48, %v1472_v20  ;;  %v2192_v19 = vld [vmem:[%s2504_s17 + $0x180] sm:$0xff] }
 0x27b   : > { %1671 = vst [vmem:[%s3298_s9 + $0x158] sm:$0xff] %v1607_v42  ;;  %v1605_v30 = vadd.f32 %v2178_v4, %v1473_v59  ;;  %v2193_v42 = vld [vmem:[%s2504_s17 + $0x198] sm:$0xff] }
 0x27d   : > { %1669 = vst [vmem:[%s3298_s9 + $0x148] sm:$0xff] %v1605_v30  ;;  %v1888_v50 = vpop.f32.mrf.mxu0  ;;  %v2194_v30 = vld [vmem:[%s2504_s17 + $0x188] sm:$0xff] }
 0x27e   : > { %v1366_v38 = vadd.f32 %v1888_v50, %v3291_v48 }
 0x27f   : > { %v1357_v8 = vpop.f32.mrf.mxu0 }
 0x280   : > { %v1578_v53 = vadd.f32 %v2179_v15, %v1366_v38  ;;  %v1358_v29 = vadd.f32 %v3291_v48, %v1357_v8 }
 0x281   : > { %v1889_v33 = vpop.f32.mrf.mxu0 }
 0x282   : > { %1642 = vst [vmem:[%s3298_s9 + $0x70] sm:$0xff] %v1578_v53  ;;  %v1576_v16 = vadd.f32 %v2180_v1, %v1358_v29  ;;  %v1369_v37 = vadd.f32 %v1889_v33, %v3291_v48  ;;  %v1920_v25 = vpop.f32.mrf.mxu1  ;;  %v2195_v53 = vld [vmem:[%s2504_s17 + $0xb0] sm:$0xff] }
 0x283   : > { %v1494_v51 = vadd.f32 %v1920_v25, %v3291_v48  ;;  %v1360_v11 = vpop.f32.mrf.mxu0 }
 0x284   : > { %1640 = vst [vmem:[%s3298_s9 + $0x60] sm:$0xff] %v1576_v16  ;;  %v1579_v22 = vadd.f32 %v2181_v49, %v1369_v37  ;;  %v1361_v21 = vadd.f32 %v3291_v48, %v1360_v11  ;;  %v1485_v57 = vpop.f32.mrf.mxu1  ;;  %v2196_v16 = vld [vmem:[%s2504_s17 + $0xa0] sm:$0xff] }
 0x285   : > { %v1610_v40 = vadd.f32 %v2182_v41, %v1494_v51  ;;  %v1486_v32 = vadd.f32 %v3291_v48, %v1485_v57 }
 0x286   : > { %1643 = vst [vmem:[%s3298_s9 + $0x78] sm:$0xff] %v1579_v22  ;;  %v1577_v55 = vadd.f32 %v2183_v14, %v1361_v21  ;;  %v1921_v56 = vpop.f32.mrf.mxu1  ;;  %v2197_v22 = vld [vmem:[%s2504_s17 + $0xb8] sm:$0xff] }
 0x287   : > { %1674 = vst [vmem:[%s3298_s9 + $0x170] sm:$0xff] %v1610_v40  ;;  %v1608_v18 = vadd.f32 %v2184_v35, %v1486_v32  ;;  %v1497_v39 = vadd.f32 %v1921_v56, %v3291_v48  ;;  %v2198_v40 = vld [vmem:[%s2504_s17 + $0x1b0] sm:$0xff] }
 0x288   : > { %1641 = vst [vmem:[%s3298_s9 + $0x68] sm:$0xff] %v1577_v55  ;;  %v1488_v2 = vpop.f32.mrf.mxu1  ;;  %v2199_v55 = vld [vmem:[%s2504_s17 + $0xa8] sm:$0xff] }
 0x289   : > { %1672 = vst [vmem:[%s3298_s9 + $0x160] sm:$0xff] %v1608_v18  ;;  %v1611_v44 = vadd.f32 %v2185_v47, %v1497_v39  ;;  %v1489_v26 = vadd.f32 %v3291_v48, %v1488_v2  ;;  %v2200_v18 = vld [vmem:[%s2504_s17 + $0x1a0] sm:$0xff] }
 0x28b   : > { %1675 = vst [vmem:[%s3298_s9 + $0x178] sm:$0xff] %v1611_v44  ;;  %v1609_v52 = vadd.f32 %v2186_v17, %v1489_v26  ;;  %v2201_v44 = vld [vmem:[%s2504_s17 + $0x1b8] sm:$0xff] }
 0x28d   : > { %1673 = vst [vmem:[%s3298_s9 + $0x168] sm:$0xff] %v1609_v52  ;;  %v1892_v54 = vpop.f32.mrf.mxu0  ;;  %v2202_v52 = vld [vmem:[%s2504_s17 + $0x1a8] sm:$0xff] }
 0x28e   : > { %v1382_v10 = vadd.f32 %v1892_v54, %v3291_v48 }
 0x28f   : > { %v1373_v34 = vpop.f32.mrf.mxu0 }
 0x290   : > { %v1582_v62 = vadd.f32 %v2187_v6, %v1382_v10  ;;  %v1374_v23 = vadd.f32 %v3291_v48, %v1373_v34 }
 0x291   : > { %v1893_v43 = vpop.f32.mrf.mxu0 }
 0x292   : > { %1646 = vst [vmem:[%s3298_s9 + $0x90] sm:$0xff] %v1582_v62  ;;  %v1580_v12 = vadd.f32 %v2188_v28, %v1374_v23  ;;  %v1385_v13 = vadd.f32 %v1893_v43, %v3291_v48  ;;  %v1924_v46 = vpop.f32.mrf.mxu1  ;;  %v2203_v62 = vld [vmem:[%s2504_s17 + $0xd0] sm:$0xff] }
 0x293   : > { %v1510_v58 = vadd.f32 %v1924_v46, %v3291_v48  ;;  %v1376_v0 = vpop.f32.mrf.mxu0 }
 0x294   : > { %1644 = vst [vmem:[%s3298_s9 + $0x80] sm:$0xff] %v1580_v12  ;;  %v1583_v24 = vadd.f32 %v2189_v5, %v1385_v13  ;;  %v1377_v3 = vadd.f32 %v3291_v48, %v1376_v0  ;;  %v1501_v45 = vpop.f32.mrf.mxu1  ;;  %v2204_v13 = vld [vmem:[%s2504_s17 + $0xc0] sm:$0xff] }
 0x295   : > { %v1614_v36 = vadd.f32 %v2190_v63, %v1510_v58  ;;  %v1502_v27 = vadd.f32 %v3291_v48, %v1501_v45  ;;  %v2206_v63 = vld [vmem:[%s2504_s17 + $0x1d0] sm:$0xff] }
 0x296   : > { %1647 = vst [vmem:[%s3298_s9 + $0x98] sm:$0xff] %v1583_v24  ;;  %v1581_v60 = vadd.f32 %v2191_v7, %v1377_v3  ;;  %v1925_v31 = vpop.f32.mrf.mxu1  ;;  %v2205_v3 = vld [vmem:[%s2504_s17 + $0xd8] sm:$0xff] }
 0x297   : > { %1678 = vst [vmem:[%s3298_s9 + $0x190] sm:$0xff] %v1614_v36  ;;  %v1612_v9 = vadd.f32 %v2192_v19, %v1502_v27  ;;  %v1513_v20 = vadd.f32 %v1925_v31, %v3291_v48  ;;  %v2207_v31 = vld [vmem:[%s2504_s17 + $0xc8] sm:$0xff] }
 0x298   : > { %1645 = vst [vmem:[%s3298_s9 + $0x88] sm:$0xff] %v1581_v60  ;;  %v1504_v61 = vpop.f32.mrf.mxu1 }
 0x299   : > { %1676 = vst [vmem:[%s3298_s9 + $0x180] sm:$0xff] %v1612_v9  ;;  %v1615_v59 = vadd.f32 %v2193_v42, %v1513_v20  ;;  %v1505_v4 = vadd.f32 %v3291_v48, %v1504_v61  ;;  %v2208_v9 = vld [vmem:[%s2504_s17 + $0x1c0] sm:$0xff] }
 0x29b   : > { %1679 = vst [vmem:[%s3298_s9 + $0x198] sm:$0xff] %v1615_v59  ;;  %v1613_v50 = vadd.f32 %v2194_v30, %v1505_v4  ;;  %v2209_v59 = vld [vmem:[%s2504_s17 + $0x1d8] sm:$0xff] }
 0x29d   : > { %1677 = vst [vmem:[%s3298_s9 + $0x188] sm:$0xff] %v1613_v50  ;;  %v1896_v38 = vpop.f32.mrf.mxu0  ;;  %v2210_v50 = vld [vmem:[%s2504_s17 + $0x1c8] sm:$0xff] }
 0x29e   : > { %v1398_v8 = vadd.f32 %v1896_v38, %v3291_v48 }
 0x29f   : > { %v1389_v15 = vpop.f32.mrf.mxu0 }
 0x2a0   : > { %v1586_v29 = vadd.f32 %v2195_v53, %v1398_v8  ;;  %v1390_v33 = vadd.f32 %v3291_v48, %v1389_v15 }
 0x2a1   : > { %v1897_v1 = vpop.f32.mrf.mxu0 }
 0x2a2   : > { %1650 = vst [vmem:[%s3298_s9 + $0xb0] sm:$0xff] %v1586_v29  ;;  %v1584_v37 = vadd.f32 %v2196_v16, %v1390_v33  ;;  %v1401_v25 = vadd.f32 %v1897_v1, %v3291_v48  ;;  %v1928_v51 = vpop.f32.mrf.mxu1  ;;  %v2211_v29 = vld [vmem:[%s2504_s17 + $0xf0] sm:$0xff] }
 0x2a3   : > { %v1526_v11 = vadd.f32 %v1928_v51, %v3291_v48  ;;  %v1392_v49 = vpop.f32.mrf.mxu0 }
 0x2a4   : > { %1648 = vst [vmem:[%s3298_s9 + $0xa0] sm:$0xff] %v1584_v37  ;;  %v1587_v21 = vadd.f32 %v2197_v22, %v1401_v25  ;;  %v1393_v57 = vadd.f32 %v3291_v48, %v1392_v49  ;;  %v1517_v41 = vpop.f32.mrf.mxu1  ;;  %v2212_v25 = vld [vmem:[%s2504_s17 + $0xe0] sm:$0xff] }
 0x2a5   : > { %v1618_v32 = vadd.f32 %v2198_v40, %v1526_v11  ;;  %v1518_v14 = vadd.f32 %v3291_v48, %v1517_v41  ;;  %v2214_v40 = vld [vmem:[%s2504_s17 + $0x1f0] sm:$0xff] }
 0x2a6   : > { %1651 = vst [vmem:[%s3298_s9 + $0xb8] sm:$0xff] %v1587_v21  ;;  %v1585_v56 = vadd.f32 %v2199_v55, %v1393_v57  ;;  %v1929_v35 = vpop.f32.mrf.mxu1  ;;  %v2213_v57 = vld [vmem:[%s2504_s17 + $0xf8] sm:$0xff] }
 0x2a7   : > { %1682 = vst [vmem:[%s3298_s9 + $0x1b0] sm:$0xff] %v1618_v32  ;;  %v1616_v39 = vadd.f32 %v2200_v18, %v1518_v14  ;;  %v1529_v2 = vadd.f32 %v1929_v35, %v3291_v48  ;;  %v2215_v35 = vld [vmem:[%s2504_s17 + $0xe8] sm:$0xff] }
 0x2a8   : > { %1649 = vst [vmem:[%s3298_s9 + $0xa8] sm:$0xff] %v1585_v56  ;;  %v1520_v47 = vpop.f32.mrf.mxu1 }
 0x2a9   : > { %1680 = vst [vmem:[%s3298_s9 + $0x1a0] sm:$0xff] %v1616_v39  ;;  %v1619_v26 = vadd.f32 %v2201_v44, %v1529_v2  ;;  %v1521_v17 = vadd.f32 %v3291_v48, %v1520_v47  ;;  %v2216_v39 = vld [vmem:[%s2504_s17 + $0x1e0] sm:$0xff] }
 0x2ab   : > { %1683 = vst [vmem:[%s3298_s9 + $0x1b8] sm:$0xff] %v1619_v26  ;;  %v1617_v54 = vadd.f32 %v2202_v52, %v1521_v17  ;;  %v2217_v26 = vld [vmem:[%s2504_s17 + $0x1f8] sm:$0xff] }
 0x2ad   : > { %1681 = vst [vmem:[%s3298_s9 + $0x1a8] sm:$0xff] %v1617_v54  ;;  %v1900_v10 = vpop.f32.mrf.mxu0  ;;  %v2218_v54 = vld [vmem:[%s2504_s17 + $0x1e8] sm:$0xff] }
 0x2ae   : > { %v1414_v34 = vadd.f32 %v1900_v10, %v3291_v48 }
 0x2af   : > { %v1405_v6 = vpop.f32.mrf.mxu0 }
 0x2b0   : > { %v1590_v23 = vadd.f32 %v2203_v62, %v1414_v34  ;;  %v1406_v43 = vadd.f32 %v3291_v48, %v1405_v6 }
 0x2b1   : > { %v1901_v28 = vpop.f32.mrf.mxu0  ;;  %v1932_v12 = vpop.f32.mrf.mxu1 }
 0x2b2   : > { %1654 = vst [vmem:[%s3298_s9 + $0xd0] sm:$0xff] %v1590_v23  ;;  %v1588_v46 = vadd.f32 %v2204_v13, %v1406_v43  ;;  %v1417_v58 = vadd.f32 %v1901_v28, %v3291_v48  ;;  %v1542_v0 = vadd.f32 %v1932_v12, %v3291_v48 }
 0x2b3   : > { %v1408_v5 = vpop.f32.mrf.mxu0  ;;  %v1533_v24 = vpop.f32.mrf.mxu1 }
 0x2b4   : > { %1652 = vst [vmem:[%s3298_s9 + $0xc0] sm:$0xff] %v1588_v46  ;;  %v1591_v45 = vadd.f32 %v2205_v3, %v1417_v58  ;;  %v1622_v36 = vadd.f32 %v2206_v63, %v1542_v0  ;;  %v1409_v27 = vadd.f32 %v3291_v48, %v1408_v5  ;;  %v1534_v7 = vadd.f32 %v3291_v48, %v1533_v24 }
 0x2b5   : > { %v1933_v60 = vpop.f32.mrf.mxu1 }
 0x2b6   : > { %1655 = vst [vmem:[%s3298_s9 + $0xd8] sm:$0xff] %v1591_v45  ;;  %1686 = vst [vmem:[%s3298_s9 + $0x1d0] sm:$0xff] %v1622_v36  ;;  %v1589_v19 = vadd.f32 %v2207_v31, %v1409_v27  ;;  %v1620_v20 = vadd.f32 %v2208_v9, %v1534_v7  ;;  %v1545_v61 = vadd.f32 %v1933_v60, %v3291_v48 }
 0x2b7   : > { %v1536_v42 = vpop.f32.mrf.mxu1 }
 0x2b8   : > { %1653 = vst [vmem:[%s3298_s9 + $0xc8] sm:$0xff] %v1589_v19  ;;  %1684 = vst [vmem:[%s3298_s9 + $0x1c0] sm:$0xff] %v1620_v20  ;;  %v1623_v4 = vadd.f32 %v2209_v59, %v1545_v61  ;;  %v1537_v30 = vadd.f32 %v3291_v48, %v1536_v42 }
 0x2ba   : > { %1687 = vst [vmem:[%s3298_s9 + $0x1d8] sm:$0xff] %v1623_v4  ;;  %v1621_v38 = vadd.f32 %v2210_v50, %v1537_v30 }
 0x2bc   : > { %1685 = vst [vmem:[%s3298_s9 + $0x1c8] sm:$0xff] %v1621_v38 }
 0x2bd   : > { %v1904_v8 = vpop.f32.mrf.mxu0 }
 0x2be   : > { %v1430_v15 = vadd.f32 %v1904_v8, %v3291_v48 }
 0x2bf   : > { %v1421_v53 = vpop.f32.mrf.mxu0 }
 0x2c0   : > { %v1594_v33 = vadd.f32 %v2211_v29, %v1430_v15  ;;  %v1422_v1 = vadd.f32 %v3291_v48, %v1421_v53 }
 0x2c1   : > { %v1905_v16 = vpop.f32.mrf.mxu0  ;;  %v1936_v37 = vpop.f32.mrf.mxu1 }
 0x2c2   : > { %1658 = vst [vmem:[%s3298_s9 + $0xf0] sm:$0xff] %v1594_v33  ;;  %v1592_v51 = vadd.f32 %v2212_v25, %v1422_v1  ;;  %v1433_v11 = vadd.f32 %v1905_v16, %v3291_v48  ;;  %v1558_v49 = vadd.f32 %v1936_v37, %v3291_v48 }
 0x2c3   : > { %v1424_v22 = vpop.f32.mrf.mxu0  ;;  %v1549_v21 = vpop.f32.mrf.mxu1 }
 0x2c4   : > { %1656 = vst [vmem:[%s3298_s9 + $0xe0] sm:$0xff] %v1592_v51  ;;  %v1595_v41 = vadd.f32 %v2213_v57, %v1433_v11  ;;  %v1626_v32 = vadd.f32 %v2214_v40, %v1558_v49  ;;  %v1425_v14 = vadd.f32 %v3291_v48, %v1424_v22  ;;  %v1550_v55 = vadd.f32 %v3291_v48, %v1549_v21 }
 0x2c5   : > { %v1937_v56 = vpop.f32.mrf.mxu1 }
 0x2c6   : > { %1659 = vst [vmem:[%s3298_s9 + $0xf8] sm:$0xff] %v1595_v41  ;;  %1690 = vst [vmem:[%s3298_s9 + $0x1f0] sm:$0xff] %v1626_v32  ;;  %v1593_v18 = vadd.f32 %v2215_v35, %v1425_v14  ;;  %v1624_v2 = vadd.f32 %v2216_v39, %v1550_v55  ;;  %v1561_v47 = vadd.f32 %v1937_v56, %v3291_v48 }
 0x2c7   : > { %v1552_v44 = vpop.f32.mrf.mxu1 }
 0x2c8   : > { %1657 = vst [vmem:[%s3298_s9 + $0xe8] sm:$0xff] %v1593_v18  ;;  %1688 = vst [vmem:[%s3298_s9 + $0x1e0] sm:$0xff] %v1624_v2  ;;  %v1627_v17 = vadd.f32 %v2217_v26, %v1561_v47  ;;  %v1553_v52 = vadd.f32 %v3291_v48, %v1552_v44 }
 0x2ca   : > { %1691 = vst [vmem:[%s3298_s9 + $0x1f8] sm:$0xff] %v1627_v17  ;;  %v1625_v10 = vadd.f32 %v2218_v54, %v1553_v52 }
 0x2cc   : > { %1689 = vst [vmem:[%s3298_s9 + $0x1e8] sm:$0xff] %v1625_v10 }
 0x2cd   : > { %2286 = shalt.err (!%p2283_p0)
}
 0x2ce   : > { %s2287_s17 = scalar_lea.hbm %s3491_s26, 8192  ;;  %s2291_s27 = scalar_lea.hbm %s3544_s5, 16384 }
 0x2cf   : > { %p2288_p5 = scmp.ne.s32.totalorder %s3491_s26, %s2287_s17  ;;  %p2292_p4 = scmp.lt.s32.totalorder %s3491_s26, %s3544_s5 }
 0x2d0   : > { %p2293_p6 = scmp.lt.s32.totalorder %s2291_s27, %s2287_s17 }
 0x2d1   : > { %p2289_p9 = pnand %p2288_p5, %p3659_p11 }
 0x2d2   : > { %p2294_p8 = por %p2293_p6, %p2292_p4 }
 0x2d3   : > { %p2290_p1 = pneg %p2289_p9 }
 0x2d5   : > { %p2295_p3 = pnand %p2294_p8, %p2290_p1 }
 0x2d7   : > { %2298 = shalt.err (!%p2295_p3)
}
 0x2d8   : > { %s2350_s10 = smov 128   ;;  %s2351_s16 = smov 8  }
 0x2d9   : > { %1960 = dma.vmem_to_hbm [thread:$0]  (%p3659_p11), %s3493_s12, 8192, %s3491_s26, %s1693_s22, %s2350_s10, %s2350_s10, %s2351_s16  }
 0x2da PF: > { %s1721_s24 = sand.u32 1, %s2329_s18   ;;  %p3660_p7 = scmp.ne.s32.totalorder %s3583_s25, 0 }
 0x2db   : > { %p3661_p12 = scmp.ge.s32.totalorder %s2341_s21, 2  ;;  %s1722_s29 = scalar_lea.sflag [#allocation4], %s1721_s24 }
 0x2dd   : > { %p1971_p10 = pnand %p3661_p12, %p3660_p7 }
 0x2df   : > { %p1972_p2 = pneg %p1971_p10 }
 0x2e1   : > { %2324 = dma.done.wait (%p1972_p2), %s1722_s29, 8192  }
 0x2e2   : > { %2326 = vsyncadd (%p1972_p2), %s1722_s29, 4294959104  ;;  %p19_p13 = scmp.ge.s32.totalorder %s2436_s30, 4   ;;  %s3662_s18 = smov %s2333_s19 }
 0x2e3   : > { %s3663_s19 = smov %s2337_s20  ;;  %s3664_s20 = smov %s2453_s13 }
 0x2e4   : > { %s3665_s21 = smov %s2436_s30  ;;  %21 = sbr.rel (!%p19_p13) target bundleno = 6 (0x6), region = 89 }
 0x2e9   :  { %1727 = vsyncpa [#allocation3], 1 }
 0x2ea   :  { %1729 = vsyncpa [#allocation3 + $0x1], 1 }
 0x2eb   :  { %1730 = vsyncpa [#allocation6], 1 }
 0x2ec   :  { %1731 = vsyncpa [#allocation4], 1 }
 0x2ed   :  { %1733 = vsyncpa [#allocation4 + $0x1], 1 }

</bundles_post_ra>
